<compile_context>
chip_gen: v7x
topology: tpu7x:2x2x1
jax: 0.10.0
libtpu: 0.0.40
codegen_flags: <defaults>
</compile_context>

<pallas_src>
import jax
import jax.numpy as jnp
from jax.experimental import pallas as pl
from jax.experimental.pallas import tpu as pltpu


# ---------------------------------------------------------------------------
# Fused kernel: num_layers x LSTM over the full sequence + Linear + Sigmoid.
#   refs layout:
#     x_ref                      (S, B, D)   time-major input        [VMEM]
#     per layer: wih (d_in,4H), whh (H,4H), bias (1,4H)              [VMEM]
#     wh_ref                     (1, H)      head weight row         [VMEM]
#     bh_ref                     (1, 1)      head bias               [SMEM]
#     out_ref                    (S, B)      sigmoid(linear(h))      [VMEM]
#     buf_sc                     (S, B, H)   per-layer output slab   [VMEM scratch]
# ---------------------------------------------------------------------------
def make_fused_lstm_disc_kernel(S, B, D, H, num_layers):
    def kernel(*refs):
        x_ref = refs[0]
        layer_refs = refs[1:1 + 3 * num_layers]
        wh_ref = refs[1 + 3 * num_layers]
        bh_ref = refs[2 + 3 * num_layers]
        out_ref = refs[3 + 3 * num_layers]
        buf_sc = refs[4 + 3 * num_layers]

        for layer in range(num_layers):
            wih_ref, whh_ref, b_ref = layer_refs[3 * layer:3 * layer + 3]
            # Layer 0 reads the input sequence; later layers read the previous
            # layer's output slab in-place (each timestep is read before it is
            # overwritten, and the recurrence only moves forward in time).
            src = x_ref if layer == 0 else buf_sc
            wih = wih_ref[...]            # (d_in, 4H) -- resident in vregs/VMEM
            whh = whh_ref[...]            # (H, 4H)
            bias = b_ref[...]             # (1, 4H)    -- b_ih + b_hh

            def step(t, carry, src=src, wih=wih, whh=whh, bias=bias):
                h, c = carry
                x_t = src[t]                                      # (B, d_in)
                gates = (jnp.dot(x_t, wih, preferred_element_type=jnp.float32)
                         + jnp.dot(h, whh, preferred_element_type=jnp.float32)
                         + bias)                                  # (B, 4H)
                # One whole-vreg sigmoid over all gates, then static lane
                # slices (PyTorch gate order: i, f, g, o).
                sig = jax.nn.sigmoid(gates)
                i_g = sig[:, 0 * H:1 * H]
                f_g = sig[:, 1 * H:2 * H]
                o_g = sig[:, 3 * H:4 * H]
                g_g = jnp.tanh(gates[:, 2 * H:3 * H])
                c_new = f_g * c + i_g * g_g
                h_new = o_g * jnp.tanh(c_new)
                buf_sc[t] = h_new
                return (h_new, c_new)

            init = (jnp.zeros((B, H), jnp.float32),
                    jnp.zeros((B, H), jnp.float32))
            jax.lax.fori_loop(0, S, step, init, unroll=True)

        # Head: Linear(H -> 1) + Sigmoid as a VPU multiply + lane reduction
        # (avoids a 1-wide MXU output column and masked 1-lane stores).
        w_row = wh_ref[...]                                       # (1, H)
        acc = jnp.sum(buf_sc[...] * w_row[None, :, :], axis=-1)   # (S, B)
        out_ref[...] = jax.nn.sigmoid(acc + bh_ref[0, 0])

    return kernel


# ---------------------------------------------------------------------------
# Wrapper: batch-first (B, S, D) -> (B, S, 1), single fused pallas_call.
# ---------------------------------------------------------------------------
def lstm_discriminator_forward(x, params):
    B, S, D = x.shape
    lstm_params = params["lstm"]
    num_layers = len(lstm_params)
    H = lstm_params[0][1].shape[0]

    x_tm = jnp.transpose(x, (1, 0, 2)).astype(jnp.float32)   # (S, B, D)

    flat_weights = []
    for wih_t, whh_t, bias in lstm_params:
        flat_weights += [wih_t, whh_t, bias]

    vmem = pl.BlockSpec(memory_space=pltpu.MemorySpace.VMEM)
    smem = pl.BlockSpec(memory_space=pltpu.MemorySpace.SMEM)

    out_sb = pl.pallas_call(
        make_fused_lstm_disc_kernel(S, B, D, H, num_layers),
        out_shape=jax.ShapeDtypeStruct((S, B), jnp.float32),
        in_specs=[vmem] * (1 + 3 * num_layers + 1) + [smem],
        out_specs=vmem,
        scratch_shapes=[pltpu.VMEM((S, B, H), jnp.float32)],
    )(x_tm, *flat_weights, params["w_out_row"], params["b_out"])

    # time-major (S, B) -> batch-first (B, S, 1), matching
    # outputs.view(batch, seq, 1) in the reference module.
    return jnp.transpose(out_sb).reshape(B, S, 1)


# ---------------------------------------------------------------------------
# Parameter construction (PyTorch-style U(-1/sqrt(H), 1/sqrt(H)); gate order
# i, f, g, o; biases b_ih + b_hh combined).
# ---------------------------------------------------------------------------
def init_params(key, in_dim, hidden_dim, num_layers):
    H = hidden_dim
    bound = 1.0 / jnp.sqrt(jnp.float32(H))
    params = {"lstm": []}
    for layer in range(num_layers):
        d_in = in_dim if layer == 0 else H
        key, k1, k2, k3, k4 = jax.random.split(key, 5)
        w_ih = jax.random.uniform(k1, (4 * H, d_in), jnp.float32, -bound, bound)
        w_hh = jax.random.uniform(k2, (4 * H, H), jnp.float32, -bound, bound)
        b_ih = jax.random.uniform(k3, (4 * H,), jnp.float32, -bound, bound)
        b_hh = jax.random.uniform(k4, (4 * H,), jnp.float32, -bound, bound)
        params["lstm"].append(
            (w_ih.T, w_hh.T, (b_ih + b_hh).reshape(1, 4 * H)))
    key, k5, k6 = jax.random.split(key, 3)
    w_out = jax.random.uniform(k5, (1, H), jnp.float32, -bound, bound)
    b_out = jax.random.uniform(k6, (1,), jnp.float32, -bound, bound)
    params["w_out_row"] = w_out                 # (1, H)
    params["b_out"] = b_out.reshape(1, 1)       # (1, 1) -> SMEM scalar
    return params


# ---------------------------------------------------------------------------
# Pure-JAX reference (lax.scan) for the correctness check.
# ---------------------------------------------------------------------------
def reference_forward(x, params):
    B, S, _ = x.shape
    seq = jnp.transpose(x, (1, 0, 2)).astype(jnp.float32)   # (S, B, D)
    for wih_t, whh_t, bias in params["lstm"]:
        H = whh_t.shape[0]

        def step(carry, xt):
            h, c = carry
            gates = xt @ wih_t + h @ whh_t + bias
            i = jax.nn.sigmoid(gates[:, 0 * H:1 * H])
            f = jax.nn.sigmoid(gates[:, 1 * H:2 * H])
            g = jnp.tanh(gates[:, 2 * H:3 * H])
            o = jax.nn.sigmoid(gates[:, 3 * H:4 * H])
            c = f * c + i * g
            h = o * jnp.tanh(c)
            return (h, c), h

        init = (jnp.zeros((B, H), jnp.float32), jnp.zeros((B, H), jnp.float32))
        _, seq = jax.lax.scan(step, init, seq)
    flat = jnp.transpose(seq, (1, 0, 2)).reshape(B * S, -1)
    out = jax.nn.sigmoid(flat @ params["w_out_row"].T + params["b_out"][0])
    return out.reshape(B, S, 1)


if __name__ == "__main__":
    out_space_dim = 4        # LSTM input size
    lstm_layers = 2
    lstm_hidden_dim = 32
    batch, seq_len = 2, 8

    key = jax.random.PRNGKey(0)
    k_x, k_p = jax.random.split(key)
    x = jax.random.normal(k_x, (batch, seq_len, out_space_dim), jnp.float32)
    params = init_params(k_p, out_space_dim, lstm_hidden_dim, lstm_layers)

    out = jax.block_until_ready(lstm_discriminator_forward(x, params))
    ref = jax.block_until_ready(reference_forward(x, params))

    assert out.shape == (batch, seq_len, 1)
    assert jnp.allclose(out, ref, atol=1e-5, rtol=1e-5)
    print("KERNEL_OK")
</pallas_src>

<mosaic_0001>
module attributes {stable_mosaic.version = 11 : i64} {
  func.func @kernel(%arg0: memref<8x2x4xf32, #tpu.memory_space<vmem>>, %arg1: memref<4x128xf32, #tpu.memory_space<vmem>>, %arg2: memref<32x128xf32, #tpu.memory_space<vmem>>, %arg3: memref<1x128xf32, #tpu.memory_space<vmem>>, %arg4: memref<32x128xf32, #tpu.memory_space<vmem>>, %arg5: memref<32x128xf32, #tpu.memory_space<vmem>>, %arg6: memref<1x128xf32, #tpu.memory_space<vmem>>, %arg7: memref<1x32xf32, #tpu.memory_space<vmem>>, %arg8: memref<1x1xf32, #tpu.memory_space<smem>>, %arg9: memref<8x2xf32, #tpu.memory_space<vmem>>, %arg10: memref<8x2x32xf32, #tpu.memory_space<vmem>>) attributes {dimension_semantics = [], scalar_prefetch = 0 : i64, scratch_operands = 1 : i64, tpu.core_type = #tpu.core_type<tc>} {
    %c0 = arith.constant 0 : index
    %c0_0 = arith.constant 0 : index
    %0 = vector.load %arg1[%c0, %c0_0] : memref<4x128xf32, #tpu.memory_space<vmem>>, vector<4x128xf32>
    %c0_1 = arith.constant 0 : index
    %c0_2 = arith.constant 0 : index
    %1 = vector.load %arg2[%c0_1, %c0_2] : memref<32x128xf32, #tpu.memory_space<vmem>>, vector<32x128xf32>
    %c0_3 = arith.constant 0 : index
    %c0_4 = arith.constant 0 : index
    %2 = vector.load %arg3[%c0_3, %c0_4] : memref<1x128xf32, #tpu.memory_space<vmem>>, vector<1x128xf32>
    %cst = arith.constant 0.000000e+00 : f32
    %3 = vector.broadcast %cst : f32 to vector<2x32xf32>
    %cst_5 = arith.constant 0.000000e+00 : f32
    %4 = vector.broadcast %cst_5 : f32 to vector<2x32xf32>
    %c0_i32 = arith.constant 0 : i32
    %5 = arith.index_cast %c0_i32 : i32 to index
    %c0_6 = arith.constant 0 : index
    %c0_7 = arith.constant 0 : index
    %6 = vector.load %arg0[%5, %c0_6, %c0_7] : memref<8x2x4xf32, #tpu.memory_space<vmem>>, vector<1x2x4xf32>
    %7 = vector.shape_cast %6 : vector<1x2x4xf32> to vector<2x4xf32>
    %cst_8 = arith.constant dense<0.000000e+00> : vector<2x128xf32>
    %8 = tpu.matmul %7, %0, %cst_8 {dimension_numbers = #tpu.dot_dimension_numbers<[1], [0], [0], [1], [0, 0, 1, 1], [], []>} : vector<2x4xf32>, vector<4x128xf32>, vector<2x128xf32> -> vector<2x128xf32>
    %cst_9 = arith.constant dense<0.000000e+00> : vector<2x128xf32>
    %9 = tpu.matmul %3, %1, %cst_9 {dimension_numbers = #tpu.dot_dimension_numbers<[1], [0], [0], [1], [0, 0, 1, 1], [], []>} : vector<2x32xf32>, vector<32x128xf32>, vector<2x128xf32> -> vector<2x128xf32>
    %10 = arith.addf %8, %9 : vector<2x128xf32>
    %11 = vector.broadcast %2 : vector<1x128xf32> to vector<2x128xf32>
    %12 = arith.addf %10, %11 : vector<2x128xf32>
    %13 = arith.negf %12 : vector<2x128xf32>
    %14 = math.exp %13 : vector<2x128xf32>
    %cst_10 = arith.constant 1.000000e+00 : f32
    %15 = vector.broadcast %cst_10 : f32 to vector<2x128xf32>
    %16 = arith.addf %15, %14 : vector<2x128xf32>
    %17 = arith.divf %15, %16 : vector<2x128xf32>
    %18 = vector.extract_strided_slice %17 {offsets = [0, 0], sizes = [2, 32], strides = [1, 1]} : vector<2x128xf32> to vector<2x32xf32>
    %19 = vector.extract_strided_slice %17 {offsets = [0, 32], sizes = [2, 32], strides = [1, 1]} : vector<2x128xf32> to vector<2x32xf32>
    %20 = vector.extract_strided_slice %17 {offsets = [0, 96], sizes = [2, 32], strides = [1, 1]} : vector<2x128xf32> to vector<2x32xf32>
    %21 = vector.extract_strided_slice %12 {offsets = [0, 64], sizes = [2, 32], strides = [1, 1]} : vector<2x128xf32> to vector<2x32xf32>
    %22 = math.tanh %21 : vector<2x32xf32>
    %23 = arith.mulf %19, %4 : vector<2x32xf32>
    %24 = arith.mulf %18, %22 : vector<2x32xf32>
    %25 = arith.addf %23, %24 : vector<2x32xf32>
    %26 = math.tanh %25 : vector<2x32xf32>
    %27 = arith.mulf %20, %26 : vector<2x32xf32>
    %28 = arith.index_cast %c0_i32 : i32 to index
    %c0_11 = arith.constant 0 : index
    %c0_12 = arith.constant 0 : index
    %29 = vector.load %arg10[%28, %c0_11, %c0_12] : memref<8x2x32xf32, #tpu.memory_space<vmem>>, vector<1x2x32xf32>
    %30 = vector.shape_cast %29 : vector<1x2x32xf32> to vector<2x32xf32>
    %31 = vector.shape_cast %27 : vector<2x32xf32> to vector<1x2x32xf32>
    tpu.vector_store %arg10[%28, %c0_11, %c0_12], %31 {strides = array<i32>} : memref<8x2x32xf32, #tpu.memory_space<vmem>>, vector<1x2x32xf32>,
    %c1_i32 = arith.constant 1 : i32
    %32 = arith.index_cast %c1_i32 : i32 to index
    %c0_13 = arith.constant 0 : index
    %c0_14 = arith.constant 0 : index
    %33 = vector.load %arg0[%32, %c0_13, %c0_14] : memref<8x2x4xf32, #tpu.memory_space<vmem>>, vector<1x2x4xf32>
    %34 = vector.shape_cast %33 : vector<1x2x4xf32> to vector<2x4xf32>
    %cst_15 = arith.constant dense<0.000000e+00> : vector<2x128xf32>
    %35 = tpu.matmul %34, %0, %cst_15 {dimension_numbers = #tpu.dot_dimension_numbers<[1], [0], [0], [1], [0, 0, 1, 1], [], []>} : vector<2x4xf32>, vector<4x128xf32>, vector<2x128xf32> -> vector<2x128xf32>
    %cst_16 = arith.constant dense<0.000000e+00> : vector<2x128xf32>
    %36 = tpu.matmul %27, %1, %cst_16 {dimension_numbers = #tpu.dot_dimension_numbers<[1], [0], [0], [1], [0, 0, 1, 1], [], []>} : vector<2x32xf32>, vector<32x128xf32>, vector<2x128xf32> -> vector<2x128xf32>
    %37 = arith.addf %35, %36 : vector<2x128xf32>
    %38 = vector.broadcast %2 : vector<1x128xf32> to vector<2x128xf32>
    %39 = arith.addf %37, %38 : vector<2x128xf32>
    %40 = arith.negf %39 : vector<2x128xf32>
    %41 = math.exp %40 : vector<2x128xf32>
    %cst_17 = arith.constant 1.000000e+00 : f32
    %42 = vector.broadcast %cst_17 : f32 to vector<2x128xf32>
    %43 = arith.addf %42, %41 : vector<2x128xf32>
    %44 = arith.divf %42, %43 : vector<2x128xf32>
    %45 = vector.extract_strided_slice %44 {offsets = [0, 0], sizes = [2, 32], strides = [1, 1]} : vector<2x128xf32> to vector<2x32xf32>
    %46 = vector.extract_strided_slice %44 {offsets = [0, 32], sizes = [2, 32], strides = [1, 1]} : vector<2x128xf32> to vector<2x32xf32>
    %47 = vector.extract_strided_slice %44 {offsets = [0, 96], sizes = [2, 32], strides = [1, 1]} : vector<2x128xf32> to vector<2x32xf32>
    %48 = vector.extract_strided_slice %39 {offsets = [0, 64], sizes = [2, 32], strides = [1, 1]} : vector<2x128xf32> to vector<2x32xf32>
    %49 = math.tanh %48 : vector<2x32xf32>
    %50 = arith.mulf %46, %25 : vector<2x32xf32>
    %51 = arith.mulf %45, %49 : vector<2x32xf32>
    %52 = arith.addf %50, %51 : vector<2x32xf32>
    %53 = math.tanh %52 : vector<2x32xf32>
    %54 = arith.mulf %47, %53 : vector<2x32xf32>
    %55 = arith.index_cast %c1_i32 : i32 to index
    %c0_18 = arith.constant 0 : index
    %c0_19 = arith.constant 0 : index
    %56 = vector.load %arg10[%55, %c0_18, %c0_19] : memref<8x2x32xf32, #tpu.memory_space<vmem>>, vector<1x2x32xf32>
    %57 = vector.shape_cast %56 : vector<1x2x32xf32> to vector<2x32xf32>
    %58 = vector.shape_cast %54 : vector<2x32xf32> to vector<1x2x32xf32>
    tpu.vector_store %arg10[%55, %c0_18, %c0_19], %58 {strides = array<i32>} : memref<8x2x32xf32, #tpu.memory_space<vmem>>, vector<1x2x32xf32>,
    %c2_i32 = arith.constant 2 : i32
    %59 = arith.index_cast %c2_i32 : i32 to index
    %c0_20 = arith.constant 0 : index
    %c0_21 = arith.constant 0 : index
    %60 = vector.load %arg0[%59, %c0_20, %c0_21] : memref<8x2x4xf32, #tpu.memory_space<vmem>>, vector<1x2x4xf32>
    %61 = vector.shape_cast %60 : vector<1x2x4xf32> to vector<2x4xf32>
    %cst_22 = arith.constant dense<0.000000e+00> : vector<2x128xf32>
    %62 = tpu.matmul %61, %0, %cst_22 {dimension_numbers = #tpu.dot_dimension_numbers<[1], [0], [0], [1], [0, 0, 1, 1], [], []>} : vector<2x4xf32>, vector<4x128xf32>, vector<2x128xf32> -> vector<2x128xf32>
    %cst_23 = arith.constant dense<0.000000e+00> : vector<2x128xf32>
    %63 = tpu.matmul %54, %1, %cst_23 {dimension_numbers = #tpu.dot_dimension_numbers<[1], [0], [0], [1], [0, 0, 1, 1], [], []>} : vector<2x32xf32>, vector<32x128xf32>, vector<2x128xf32> -> vector<2x128xf32>
    %64 = arith.addf %62, %63 : vector<2x128xf32>
    %65 = vector.broadcast %2 : vector<1x128xf32> to vector<2x128xf32>
    %66 = arith.addf %64, %65 : vector<2x128xf32>
    %67 = arith.negf %66 : vector<2x128xf32>
    %68 = math.exp %67 : vector<2x128xf32>
    %cst_24 = arith.constant 1.000000e+00 : f32
    %69 = vector.broadcast %cst_24 : f32 to vector<2x128xf32>
    %70 = arith.addf %69, %68 : vector<2x128xf32>
    %71 = arith.divf %69, %70 : vector<2x128xf32>
    %72 = vector.extract_strided_slice %71 {offsets = [0, 0], sizes = [2, 32], strides = [1, 1]} : vector<2x128xf32> to vector<2x32xf32>
    %73 = vector.extract_strided_slice %71 {offsets = [0, 32], sizes = [2, 32], strides = [1, 1]} : vector<2x128xf32> to vector<2x32xf32>
    %74 = vector.extract_strided_slice %71 {offsets = [0, 96], sizes = [2, 32], strides = [1, 1]} : vector<2x128xf32> to vector<2x32xf32>
    %75 = vector.extract_strided_slice %66 {offsets = [0, 64], sizes = [2, 32], strides = [1, 1]} : vector<2x128xf32> to vector<2x32xf32>
    %76 = math.tanh %75 : vector<2x32xf32>
    %77 = arith.mulf %73, %52 : vector<2x32xf32>
    %78 = arith.mulf %72, %76 : vector<2x32xf32>
    %79 = arith.addf %77, %78 : vector<2x32xf32>
    %80 = math.tanh %79 : vector<2x32xf32>
    %81 = arith.mulf %74, %80 : vector<2x32xf32>
    %82 = arith.index_cast %c2_i32 : i32 to index
    %c0_25 = arith.constant 0 : index
    %c0_26 = arith.constant 0 : index
    %83 = vector.load %arg10[%82, %c0_25, %c0_26] : memref<8x2x32xf32, #tpu.memory_space<vmem>>, vector<1x2x32xf32>
    %84 = vector.shape_cast %83 : vector<1x2x32xf32> to vector<2x32xf32>
    %85 = vector.shape_cast %81 : vector<2x32xf32> to vector<1x2x32xf32>
    tpu.vector_store %arg10[%82, %c0_25, %c0_26], %85 {strides = array<i32>} : memref<8x2x32xf32, #tpu.memory_space<vmem>>, vector<1x2x32xf32>,
    %c3_i32 = arith.constant 3 : i32
    %86 = arith.index_cast %c3_i32 : i32 to index
    %c0_27 = arith.constant 0 : index
    %c0_28 = arith.constant 0 : index
    %87 = vector.load %arg0[%86, %c0_27, %c0_28] : memref<8x2x4xf32, #tpu.memory_space<vmem>>, vector<1x2x4xf32>
    %88 = vector.shape_cast %87 : vector<1x2x4xf32> to vector<2x4xf32>
    %cst_29 = arith.constant dense<0.000000e+00> : vector<2x128xf32>
    %89 = tpu.matmul %88, %0, %cst_29 {dimension_numbers = #tpu.dot_dimension_numbers<[1], [0], [0], [1], [0, 0, 1, 1], [], []>} : vector<2x4xf32>, vector<4x128xf32>, vector<2x128xf32> -> vector<2x128xf32>
    %cst_30 = arith.constant dense<0.000000e+00> : vector<2x128xf32>
    %90 = tpu.matmul %81, %1, %cst_30 {dimension_numbers = #tpu.dot_dimension_numbers<[1], [0], [0], [1], [0, 0, 1, 1], [], []>} : vector<2x32xf32>, vector<32x128xf32>, vector<2x128xf32> -> vector<2x128xf32>
    %91 = arith.addf %89, %90 : vector<2x128xf32>
    %92 = vector.broadcast %2 : vector<1x128xf32> to vector<2x128xf32>
    %93 = arith.addf %91, %92 : vector<2x128xf32>
    %94 = arith.negf %93 : vector<2x128xf32>
    %95 = math.exp %94 : vector<2x128xf32>
    %cst_31 = arith.constant 1.000000e+00 : f32
    %96 = vector.broadcast %cst_31 : f32 to vector<2x128xf32>
    %97 = arith.addf %96, %95 : vector<2x128xf32>
    %98 = arith.divf %96, %97 : vector<2x128xf32>
    %99 = vector.extract_strided_slice %98 {offsets = [0, 0], sizes = [2, 32], strides = [1, 1]} : vector<2x128xf32> to vector<2x32xf32>
    %100 = vector.extract_strided_slice %98 {offsets = [0, 32], sizes = [2, 32], strides = [1, 1]} : vector<2x128xf32> to vector<2x32xf32>
    %101 = vector.extract_strided_slice %98 {offsets = [0, 96], sizes = [2, 32], strides = [1, 1]} : vector<2x128xf32> to vector<2x32xf32>
    %102 = vector.extract_strided_slice %93 {offsets = [0, 64], sizes = [2, 32], strides = [1, 1]} : vector<2x128xf32> to vector<2x32xf32>
    %103 = math.tanh %102 : vector<2x32xf32>
    %104 = arith.mulf %100, %79 : vector<2x32xf32>
    %105 = arith.mulf %99, %103 : vector<2x32xf32>
    %106 = arith.addf %104, %105 : vector<2x32xf32>
    %107 = math.tanh %106 : vector<2x32xf32>
    %108 = arith.mulf %101, %107 : vector<2x32xf32>
    %109 = arith.index_cast %c3_i32 : i32 to index
    %c0_32 = arith.constant 0 : index
    %c0_33 = arith.constant 0 : index
    %110 = vector.load %arg10[%109, %c0_32, %c0_33] : memref<8x2x32xf32, #tpu.memory_space<vmem>>, vector<1x2x32xf32>
    %111 = vector.shape_cast %110 : vector<1x2x32xf32> to vector<2x32xf32>
    %112 = vector.shape_cast %108 : vector<2x32xf32> to vector<1x2x32xf32>
    tpu.vector_store %arg10[%109, %c0_32, %c0_33], %112 {strides = array<i32>} : memref<8x2x32xf32, #tpu.memory_space<vmem>>, vector<1x2x32xf32>,
    %c4_i32 = arith.constant 4 : i32
    %113 = arith.index_cast %c4_i32 : i32 to index
    %c0_34 = arith.constant 0 : index
    %c0_35 = arith.constant 0 : index
    %114 = vector.load %arg0[%113, %c0_34, %c0_35] : memref<8x2x4xf32, #tpu.memory_space<vmem>>, vector<1x2x4xf32>
    %115 = vector.shape_cast %114 : vector<1x2x4xf32> to vector<2x4xf32>
    %cst_36 = arith.constant dense<0.000000e+00> : vector<2x128xf32>
    %116 = tpu.matmul %115, %0, %cst_36 {dimension_numbers = #tpu.dot_dimension_numbers<[1], [0], [0], [1], [0, 0, 1, 1], [], []>} : vector<2x4xf32>, vector<4x128xf32>, vector<2x128xf32> -> vector<2x128xf32>
    %cst_37 = arith.constant dense<0.000000e+00> : vector<2x128xf32>
    %117 = tpu.matmul %108, %1, %cst_37 {dimension_numbers = #tpu.dot_dimension_numbers<[1], [0], [0], [1], [0, 0, 1, 1], [], []>} : vector<2x32xf32>, vector<32x128xf32>, vector<2x128xf32> -> vector<2x128xf32>
    %118 = arith.addf %116, %117 : vector<2x128xf32>
    %119 = vector.broadcast %2 : vector<1x128xf32> to vector<2x128xf32>
    %120 = arith.addf %118, %119 : vector<2x128xf32>
    %121 = arith.negf %120 : vector<2x128xf32>
    %122 = math.exp %121 : vector<2x128xf32>
    %cst_38 = arith.constant 1.000000e+00 : f32
    %123 = vector.broadcast %cst_38 : f32 to vector<2x128xf32>
    %124 = arith.addf %123, %122 : vector<2x128xf32>
    %125 = arith.divf %123, %124 : vector<2x128xf32>
    %126 = vector.extract_strided_slice %125 {offsets = [0, 0], sizes = [2, 32], strides = [1, 1]} : vector<2x128xf32> to vector<2x32xf32>
    %127 = vector.extract_strided_slice %125 {offsets = [0, 32], sizes = [2, 32], strides = [1, 1]} : vector<2x128xf32> to vector<2x32xf32>
    %128 = vector.extract_strided_slice %125 {offsets = [0, 96], sizes = [2, 32], strides = [1, 1]} : vector<2x128xf32> to vector<2x32xf32>
    %129 = vector.extract_strided_slice %120 {offsets = [0, 64], sizes = [2, 32], strides = [1, 1]} : vector<2x128xf32> to vector<2x32xf32>
    %130 = math.tanh %129 : vector<2x32xf32>
    %131 = arith.mulf %127, %106 : vector<2x32xf32>
    %132 = arith.mulf %126, %130 : vector<2x32xf32>
    %133 = arith.addf %131, %132 : vector<2x32xf32>
    %134 = math.tanh %133 : vector<2x32xf32>
    %135 = arith.mulf %128, %134 : vector<2x32xf32>
    %136 = arith.index_cast %c4_i32 : i32 to index
    %c0_39 = arith.constant 0 : index
    %c0_40 = arith.constant 0 : index
    %137 = vector.load %arg10[%136, %c0_39, %c0_40] : memref<8x2x32xf32, #tpu.memory_space<vmem>>, vector<1x2x32xf32>
    %138 = vector.shape_cast %137 : vector<1x2x32xf32> to vector<2x32xf32>
    %139 = vector.shape_cast %135 : vector<2x32xf32> to vector<1x2x32xf32>
    tpu.vector_store %arg10[%136, %c0_39, %c0_40], %139 {strides = array<i32>} : memref<8x2x32xf32, #tpu.memory_space<vmem>>, vector<1x2x32xf32>,
    %c5_i32 = arith.constant 5 : i32
    %140 = arith.index_cast %c5_i32 : i32 to index
    %c0_41 = arith.constant 0 : index
    %c0_42 = arith.constant 0 : index
    %141 = vector.load %arg0[%140, %c0_41, %c0_42] : memref<8x2x4xf32, #tpu.memory_space<vmem>>, vector<1x2x4xf32>
    %142 = vector.shape_cast %141 : vector<1x2x4xf32> to vector<2x4xf32>
    %cst_43 = arith.constant dense<0.000000e+00> : vector<2x128xf32>
    %143 = tpu.matmul %142, %0, %cst_43 {dimension_numbers = #tpu.dot_dimension_numbers<[1], [0], [0], [1], [0, 0, 1, 1], [], []>} : vector<2x4xf32>, vector<4x128xf32>, vector<2x128xf32> -> vector<2x128xf32>
    %cst_44 = arith.constant dense<0.000000e+00> : vector<2x128xf32>
    %144 = tpu.matmul %135, %1, %cst_44 {dimension_numbers = #tpu.dot_dimension_numbers<[1], [0], [0], [1], [0, 0, 1, 1], [], []>} : vector<2x32xf32>, vector<32x128xf32>, vector<2x128xf32> -> vector<2x128xf32>
    %145 = arith.addf %143, %144 : vector<2x128xf32>
    %146 = vector.broadcast %2 : vector<1x128xf32> to vector<2x128xf32>
    %147 = arith.addf %145, %146 : vector<2x128xf32>
    %148 = arith.negf %147 : vector<2x128xf32>
    %149 = math.exp %148 : vector<2x128xf32>
    %cst_45 = arith.constant 1.000000e+00 : f32
    %150 = vector.broadcast %cst_45 : f32 to vector<2x128xf32>
    %151 = arith.addf %150, %149 : vector<2x128xf32>
    %152 = arith.divf %150, %151 : vector<2x128xf32>
    %153 = vector.extract_strided_slice %152 {offsets = [0, 0], sizes = [2, 32], strides = [1, 1]} : vector<2x128xf32> to vector<2x32xf32>
    %154 = vector.extract_strided_slice %152 {offsets = [0, 32], sizes = [2, 32], strides = [1, 1]} : vector<2x128xf32> to vector<2x32xf32>
    %155 = vector.extract_strided_slice %152 {offsets = [0, 96], sizes = [2, 32], strides = [1, 1]} : vector<2x128xf32> to vector<2x32xf32>
    %156 = vector.extract_strided_slice %147 {offsets = [0, 64], sizes = [2, 32], strides = [1, 1]} : vector<2x128xf32> to vector<2x32xf32>
    %157 = math.tanh %156 : vector<2x32xf32>
    %158 = arith.mulf %154, %133 : vector<2x32xf32>
    %159 = arith.mulf %153, %157 : vector<2x32xf32>
    %160 = arith.addf %158, %159 : vector<2x32xf32>
    %161 = math.tanh %160 : vector<2x32xf32>
    %162 = arith.mulf %155, %161 : vector<2x32xf32>
    %163 = arith.index_cast %c5_i32 : i32 to index
    %c0_46 = arith.constant 0 : index
    %c0_47 = arith.constant 0 : index
    %164 = vector.load %arg10[%163, %c0_46, %c0_47] : memref<8x2x32xf32, #tpu.memory_space<vmem>>, vector<1x2x32xf32>
    %165 = vector.shape_cast %164 : vector<1x2x32xf32> to vector<2x32xf32>
    %166 = vector.shape_cast %162 : vector<2x32xf32> to vector<1x2x32xf32>
    tpu.vector_store %arg10[%163, %c0_46, %c0_47], %166 {strides = array<i32>} : memref<8x2x32xf32, #tpu.memory_space<vmem>>, vector<1x2x32xf32>,
    %c6_i32 = arith.constant 6 : i32
    %167 = arith.index_cast %c6_i32 : i32 to index
    %c0_48 = arith.constant 0 : index
    %c0_49 = arith.constant 0 : index
    %168 = vector.load %arg0[%167, %c0_48, %c0_49] : memref<8x2x4xf32, #tpu.memory_space<vmem>>, vector<1x2x4xf32>
    %169 = vector.shape_cast %168 : vector<1x2x4xf32> to vector<2x4xf32>
    %cst_50 = arith.constant dense<0.000000e+00> : vector<2x128xf32>
    %170 = tpu.matmul %169, %0, %cst_50 {dimension_numbers = #tpu.dot_dimension_numbers<[1], [0], [0], [1], [0, 0, 1, 1], [], []>} : vector<2x4xf32>, vector<4x128xf32>, vector<2x128xf32> -> vector<2x128xf32>
    %cst_51 = arith.constant dense<0.000000e+00> : vector<2x128xf32>
    %171 = tpu.matmul %162, %1, %cst_51 {dimension_numbers = #tpu.dot_dimension_numbers<[1], [0], [0], [1], [0, 0, 1, 1], [], []>} : vector<2x32xf32>, vector<32x128xf32>, vector<2x128xf32> -> vector<2x128xf32>
    %172 = arith.addf %170, %171 : vector<2x128xf32>
    %173 = vector.broadcast %2 : vector<1x128xf32> to vector<2x128xf32>
    %174 = arith.addf %172, %173 : vector<2x128xf32>
    %175 = arith.negf %174 : vector<2x128xf32>
    %176 = math.exp %175 : vector<2x128xf32>
    %cst_52 = arith.constant 1.000000e+00 : f32
    %177 = vector.broadcast %cst_52 : f32 to vector<2x128xf32>
    %178 = arith.addf %177, %176 : vector<2x128xf32>
    %179 = arith.divf %177, %178 : vector<2x128xf32>
    %180 = vector.extract_strided_slice %179 {offsets = [0, 0], sizes = [2, 32], strides = [1, 1]} : vector<2x128xf32> to vector<2x32xf32>
    %181 = vector.extract_strided_slice %179 {offsets = [0, 32], sizes = [2, 32], strides = [1, 1]} : vector<2x128xf32> to vector<2x32xf32>
    %182 = vector.extract_strided_slice %179 {offsets = [0, 96], sizes = [2, 32], strides = [1, 1]} : vector<2x128xf32> to vector<2x32xf32>
    %183 = vector.extract_strided_slice %174 {offsets = [0, 64], sizes = [2, 32], strides = [1, 1]} : vector<2x128xf32> to vector<2x32xf32>
    %184 = math.tanh %183 : vector<2x32xf32>
    %185 = arith.mulf %181, %160 : vector<2x32xf32>
    %186 = arith.mulf %180, %184 : vector<2x32xf32>
    %187 = arith.addf %185, %186 : vector<2x32xf32>
    %188 = math.tanh %187 : vector<2x32xf32>
    %189 = arith.mulf %182, %188 : vector<2x32xf32>
    %190 = arith.index_cast %c6_i32 : i32 to index
    %c0_53 = arith.constant 0 : index
    %c0_54 = arith.constant 0 : index
    %191 = vector.load %arg10[%190, %c0_53, %c0_54] : memref<8x2x32xf32, #tpu.memory_space<vmem>>, vector<1x2x32xf32>
    %192 = vector.shape_cast %191 : vector<1x2x32xf32> to vector<2x32xf32>
    %193 = vector.shape_cast %189 : vector<2x32xf32> to vector<1x2x32xf32>
    tpu.vector_store %arg10[%190, %c0_53, %c0_54], %193 {strides = array<i32>} : memref<8x2x32xf32, #tpu.memory_space<vmem>>, vector<1x2x32xf32>,
    %c7_i32 = arith.constant 7 : i32
    %194 = arith.index_cast %c7_i32 : i32 to index
    %c0_55 = arith.constant 0 : index
    %c0_56 = arith.constant 0 : index
    %195 = vector.load %arg0[%194, %c0_55, %c0_56] : memref<8x2x4xf32, #tpu.memory_space<vmem>>, vector<1x2x4xf32>
    %196 = vector.shape_cast %195 : vector<1x2x4xf32> to vector<2x4xf32>
    %cst_57 = arith.constant dense<0.000000e+00> : vector<2x128xf32>
    %197 = tpu.matmul %196, %0, %cst_57 {dimension_numbers = #tpu.dot_dimension_numbers<[1], [0], [0], [1], [0, 0, 1, 1], [], []>} : vector<2x4xf32>, vector<4x128xf32>, vector<2x128xf32> -> vector<2x128xf32>
    %cst_58 = arith.constant dense<0.000000e+00> : vector<2x128xf32>
    %198 = tpu.matmul %189, %1, %cst_58 {dimension_numbers = #tpu.dot_dimension_numbers<[1], [0], [0], [1], [0, 0, 1, 1], [], []>} : vector<2x32xf32>, vector<32x128xf32>, vector<2x128xf32> -> vector<2x128xf32>
    %199 = arith.addf %197, %198 : vector<2x128xf32>
    %200 = vector.broadcast %2 : vector<1x128xf32> to vector<2x128xf32>
    %201 = arith.addf %199, %200 : vector<2x128xf32>
    %202 = arith.negf %201 : vector<2x128xf32>
    %203 = math.exp %202 : vector<2x128xf32>
    %cst_59 = arith.constant 1.000000e+00 : f32
    %204 = vector.broadcast %cst_59 : f32 to vector<2x128xf32>
    %205 = arith.addf %204, %203 : vector<2x128xf32>
    %206 = arith.divf %204, %205 : vector<2x128xf32>
    %207 = vector.extract_strided_slice %206 {offsets = [0, 0], sizes = [2, 32], strides = [1, 1]} : vector<2x128xf32> to vector<2x32xf32>
    %208 = vector.extract_strided_slice %206 {offsets = [0, 32], sizes = [2, 32], strides = [1, 1]} : vector<2x128xf32> to vector<2x32xf32>
    %209 = vector.extract_strided_slice %206 {offsets = [0, 96], sizes = [2, 32], strides = [1, 1]} : vector<2x128xf32> to vector<2x32xf32>
    %210 = vector.extract_strided_slice %201 {offsets = [0, 64], sizes = [2, 32], strides = [1, 1]} : vector<2x128xf32> to vector<2x32xf32>
    %211 = math.tanh %210 : vector<2x32xf32>
    %212 = arith.mulf %208, %187 : vector<2x32xf32>
    %213 = arith.mulf %207, %211 : vector<2x32xf32>
    %214 = arith.addf %212, %213 : vector<2x32xf32>
    %215 = math.tanh %214 : vector<2x32xf32>
    %216 = arith.mulf %209, %215 : vector<2x32xf32>
    %217 = arith.index_cast %c7_i32 : i32 to index
    %c0_60 = arith.constant 0 : index
    %c0_61 = arith.constant 0 : index
    %218 = vector.load %arg10[%217, %c0_60, %c0_61] : memref<8x2x32xf32, #tpu.memory_space<vmem>>, vector<1x2x32xf32>
    %219 = vector.shape_cast %218 : vector<1x2x32xf32> to vector<2x32xf32>
    %220 = vector.shape_cast %216 : vector<2x32xf32> to vector<1x2x32xf32>
    tpu.vector_store %arg10[%217, %c0_60, %c0_61], %220 {strides = array<i32>} : memref<8x2x32xf32, #tpu.memory_space<vmem>>, vector<1x2x32xf32>,
    %c8_i32 = arith.constant 8 : i32
    %c0_62 = arith.constant 0 : index
    %c0_63 = arith.constant 0 : index
    %221 = vector.load %arg4[%c0_62, %c0_63] : memref<32x128xf32, #tpu.memory_space<vmem>>, vector<32x128xf32>
    %c0_64 = arith.constant 0 : index
    %c0_65 = arith.constant 0 : index
    %222 = vector.load %arg5[%c0_64, %c0_65] : memref<32x128xf32, #tpu.memory_space<vmem>>, vector<32x128xf32>
    %c0_66 = arith.constant 0 : index
    %c0_67 = arith.constant 0 : index
    %223 = vector.load %arg6[%c0_66, %c0_67] : memref<1x128xf32, #tpu.memory_space<vmem>>, vector<1x128xf32>
    %cst_68 = arith.constant 0.000000e+00 : f32
    %224 = vector.broadcast %cst_68 : f32 to vector<2x32xf32>
    %cst_69 = arith.constant 0.000000e+00 : f32
    %225 = vector.broadcast %cst_69 : f32 to vector<2x32xf32>
    %c0_i32_70 = arith.constant 0 : i32
    %226 = arith.index_cast %c0_i32_70 : i32 to index
    %c0_71 = arith.constant 0 : index
    %c0_72 = arith.constant 0 : index
    %227 = vector.load %arg10[%226, %c0_71, %c0_72] : memref<8x2x32xf32, #tpu.memory_space<vmem>>, vector<1x2x32xf32>
    %228 = vector.shape_cast %227 : vector<1x2x32xf32> to vector<2x32xf32>
    %cst_73 = arith.constant dense<0.000000e+00> : vector<2x128xf32>
    %229 = tpu.matmul %228, %221, %cst_73 {dimension_numbers = #tpu.dot_dimension_numbers<[1], [0], [0], [1], [0, 0, 1, 1], [], []>} : vector<2x32xf32>, vector<32x128xf32>, vector<2x128xf32> -> vector<2x128xf32>
    %cst_74 = arith.constant dense<0.000000e+00> : vector<2x128xf32>
    %230 = tpu.matmul %224, %222, %cst_74 {dimension_numbers = #tpu.dot_dimension_numbers<[1], [0], [0], [1], [0, 0, 1, 1], [], []>} : vector<2x32xf32>, vector<32x128xf32>, vector<2x128xf32> -> vector<2x128xf32>
    %231 = arith.addf %229, %230 : vector<2x128xf32>
    %232 = vector.broadcast %223 : vector<1x128xf32> to vector<2x128xf32>
    %233 = arith.addf %231, %232 : vector<2x128xf32>
    %234 = arith.negf %233 : vector<2x128xf32>
    %235 = math.exp %234 : vector<2x128xf32>
    %cst_75 = arith.constant 1.000000e+00 : f32
    %236 = vector.broadcast %cst_75 : f32 to vector<2x128xf32>
    %237 = arith.addf %236, %235 : vector<2x128xf32>
    %238 = arith.divf %236, %237 : vector<2x128xf32>
    %239 = vector.extract_strided_slice %238 {offsets = [0, 0], sizes = [2, 32], strides = [1, 1]} : vector<2x128xf32> to vector<2x32xf32>
    %240 = vector.extract_strided_slice %238 {offsets = [0, 32], sizes = [2, 32], strides = [1, 1]} : vector<2x128xf32> to vector<2x32xf32>
    %241 = vector.extract_strided_slice %238 {offsets = [0, 96], sizes = [2, 32], strides = [1, 1]} : vector<2x128xf32> to vector<2x32xf32>
    %242 = vector.extract_strided_slice %233 {offsets = [0, 64], sizes = [2, 32], strides = [1, 1]} : vector<2x128xf32> to vector<2x32xf32>
    %243 = math.tanh %242 : vector<2x32xf32>
    %244 = arith.mulf %240, %225 : vector<2x32xf32>
    %245 = arith.mulf %239, %243 : vector<2x32xf32>
    %246 = arith.addf %244, %245 : vector<2x32xf32>
    %247 = math.tanh %246 : vector<2x32xf32>
    %248 = arith.mulf %241, %247 : vector<2x32xf32>
    %249 = arith.index_cast %c0_i32_70 : i32 to index
    %c0_76 = arith.constant 0 : index
    %c0_77 = arith.constant 0 : index
    %250 = vector.load %arg10[%249, %c0_76, %c0_77] : memref<8x2x32xf32, #tpu.memory_space<vmem>>, vector<1x2x32xf32>
    %251 = vector.shape_cast %250 : vector<1x2x32xf32> to vector<2x32xf32>
    %252 = vector.shape_cast %248 : vector<2x32xf32> to vector<1x2x32xf32>
    tpu.vector_store %arg10[%249, %c0_76, %c0_77], %252 {strides = array<i32>} : memref<8x2x32xf32, #tpu.memory_space<vmem>>, vector<1x2x32xf32>,
    %c1_i32_78 = arith.constant 1 : i32
    %253 = arith.index_cast %c1_i32_78 : i32 to index
    %c0_79 = arith.constant 0 : index
    %c0_80 = arith.constant 0 : index
    %254 = vector.load %arg10[%253, %c0_79, %c0_80] : memref<8x2x32xf32, #tpu.memory_space<vmem>>, vector<1x2x32xf32>
    %255 = vector.shape_cast %254 : vector<1x2x32xf32> to vector<2x32xf32>
    %cst_81 = arith.constant dense<0.000000e+00> : vector<2x128xf32>
    %256 = tpu.matmul %255, %221, %cst_81 {dimension_numbers = #tpu.dot_dimension_numbers<[1], [0], [0], [1], [0, 0, 1, 1], [], []>} : vector<2x32xf32>, vector<32x128xf32>, vector<2x128xf32> -> vector<2x128xf32>
    %cst_82 = arith.constant dense<0.000000e+00> : vector<2x128xf32>
    %257 = tpu.matmul %248, %222, %cst_82 {dimension_numbers = #tpu.dot_dimension_numbers<[1], [0], [0], [1], [0, 0, 1, 1], [], []>} : vector<2x32xf32>, vector<32x128xf32>, vector<2x128xf32> -> vector<2x128xf32>
    %258 = arith.addf %256, %257 : vector<2x128xf32>
    %259 = vector.broadcast %223 : vector<1x128xf32> to vector<2x128xf32>
    %260 = arith.addf %258, %259 : vector<2x128xf32>
    %261 = arith.negf %260 : vector<2x128xf32>
    %262 = math.exp %261 : vector<2x128xf32>
    %cst_83 = arith.constant 1.000000e+00 : f32
    %263 = vector.broadcast %cst_83 : f32 to vector<2x128xf32>
    %264 = arith.addf %263, %262 : vector<2x128xf32>
    %265 = arith.divf %263, %264 : vector<2x128xf32>
    %266 = vector.extract_strided_slice %265 {offsets = [0, 0], sizes = [2, 32], strides = [1, 1]} : vector<2x128xf32> to vector<2x32xf32>
    %267 = vector.extract_strided_slice %265 {offsets = [0, 32], sizes = [2, 32], strides = [1, 1]} : vector<2x128xf32> to vector<2x32xf32>
    %268 = vector.extract_strided_slice %265 {offsets = [0, 96], sizes = [2, 32], strides = [1, 1]} : vector<2x128xf32> to vector<2x32xf32>
    %269 = vector.extract_strided_slice %260 {offsets = [0, 64], sizes = [2, 32], strides = [1, 1]} : vector<2x128xf32> to vector<2x32xf32>
    %270 = math.tanh %269 : vector<2x32xf32>
    %271 = arith.mulf %267, %246 : vector<2x32xf32>
    %272 = arith.mulf %266, %270 : vector<2x32xf32>
    %273 = arith.addf %271, %272 : vector<2x32xf32>
    %274 = math.tanh %273 : vector<2x32xf32>
    %275 = arith.mulf %268, %274 : vector<2x32xf32>
    %276 = arith.index_cast %c1_i32_78 : i32 to index
    %c0_84 = arith.constant 0 : index
    %c0_85 = arith.constant 0 : index
    %277 = vector.load %arg10[%276, %c0_84, %c0_85] : memref<8x2x32xf32, #tpu.memory_space<vmem>>, vector<1x2x32xf32>
    %278 = vector.shape_cast %277 : vector<1x2x32xf32> to vector<2x32xf32>
    %279 = vector.shape_cast %275 : vector<2x32xf32> to vector<1x2x32xf32>
    tpu.vector_store %arg10[%276, %c0_84, %c0_85], %279 {strides = array<i32>} : memref<8x2x32xf32, #tpu.memory_space<vmem>>, vector<1x2x32xf32>,
    %c2_i32_86 = arith.constant 2 : i32
    %280 = arith.index_cast %c2_i32_86 : i32 to index
    %c0_87 = arith.constant 0 : index
    %c0_88 = arith.constant 0 : index
    %281 = vector.load %arg10[%280, %c0_87, %c0_88] : memref<8x2x32xf32, #tpu.memory_space<vmem>>, vector<1x2x32xf32>
    %282 = vector.shape_cast %281 : vector<1x2x32xf32> to vector<2x32xf32>
    %cst_89 = arith.constant dense<0.000000e+00> : vector<2x128xf32>
    %283 = tpu.matmul %282, %221, %cst_89 {dimension_numbers = #tpu.dot_dimension_numbers<[1], [0], [0], [1], [0, 0, 1, 1], [], []>} : vector<2x32xf32>, vector<32x128xf32>, vector<2x128xf32> -> vector<2x128xf32>
    %cst_90 = arith.constant dense<0.000000e+00> : vector<2x128xf32>
    %284 = tpu.matmul %275, %222, %cst_90 {dimension_numbers = #tpu.dot_dimension_numbers<[1], [0], [0], [1], [0, 0, 1, 1], [], []>} : vector<2x32xf32>, vector<32x128xf32>, vector<2x128xf32> -> vector<2x128xf32>
    %285 = arith.addf %283, %284 : vector<2x128xf32>
    %286 = vector.broadcast %223 : vector<1x128xf32> to vector<2x128xf32>
    %287 = arith.addf %285, %286 : vector<2x128xf32>
    %288 = arith.negf %287 : vector<2x128xf32>
    %289 = math.exp %288 : vector<2x128xf32>
    %cst_91 = arith.constant 1.000000e+00 : f32
    %290 = vector.broadcast %cst_91 : f32 to vector<2x128xf32>
    %291 = arith.addf %290, %289 : vector<2x128xf32>
    %292 = arith.divf %290, %291 : vector<2x128xf32>
    %293 = vector.extract_strided_slice %292 {offsets = [0, 0], sizes = [2, 32], strides = [1, 1]} : vector<2x128xf32> to vector<2x32xf32>
    %294 = vector.extract_strided_slice %292 {offsets = [0, 32], sizes = [2, 32], strides = [1, 1]} : vector<2x128xf32> to vector<2x32xf32>
    %295 = vector.extract_strided_slice %292 {offsets = [0, 96], sizes = [2, 32], strides = [1, 1]} : vector<2x128xf32> to vector<2x32xf32>
    %296 = vector.extract_strided_slice %287 {offsets = [0, 64], sizes = [2, 32], strides = [1, 1]} : vector<2x128xf32> to vector<2x32xf32>
    %297 = math.tanh %296 : vector<2x32xf32>
    %298 = arith.mulf %294, %273 : vector<2x32xf32>
    %299 = arith.mulf %293, %297 : vector<2x32xf32>
    %300 = arith.addf %298, %299 : vector<2x32xf32>
    %301 = math.tanh %300 : vector<2x32xf32>
    %302 = arith.mulf %295, %301 : vector<2x32xf32>
    %303 = arith.index_cast %c2_i32_86 : i32 to index
    %c0_92 = arith.constant 0 : index
    %c0_93 = arith.constant 0 : index
    %304 = vector.load %arg10[%303, %c0_92, %c0_93] : memref<8x2x32xf32, #tpu.memory_space<vmem>>, vector<1x2x32xf32>
    %305 = vector.shape_cast %304 : vector<1x2x32xf32> to vector<2x32xf32>
    %306 = vector.shape_cast %302 : vector<2x32xf32> to vector<1x2x32xf32>
    tpu.vector_store %arg10[%303, %c0_92, %c0_93], %306 {strides = array<i32>} : memref<8x2x32xf32, #tpu.memory_space<vmem>>, vector<1x2x32xf32>,
    %c3_i32_94 = arith.constant 3 : i32
    %307 = arith.index_cast %c3_i32_94 : i32 to index
    %c0_95 = arith.constant 0 : index
    %c0_96 = arith.constant 0 : index
    %308 = vector.load %arg10[%307, %c0_95, %c0_96] : memref<8x2x32xf32, #tpu.memory_space<vmem>>, vector<1x2x32xf32>
    %309 = vector.shape_cast %308 : vector<1x2x32xf32> to vector<2x32xf32>
    %cst_97 = arith.constant dense<0.000000e+00> : vector<2x128xf32>
    %310 = tpu.matmul %309, %221, %cst_97 {dimension_numbers = #tpu.dot_dimension_numbers<[1], [0], [0], [1], [0, 0, 1, 1], [], []>} : vector<2x32xf32>, vector<32x128xf32>, vector<2x128xf32> -> vector<2x128xf32>
    %cst_98 = arith.constant dense<0.000000e+00> : vector<2x128xf32>
    %311 = tpu.matmul %302, %222, %cst_98 {dimension_numbers = #tpu.dot_dimension_numbers<[1], [0], [0], [1], [0, 0, 1, 1], [], []>} : vector<2x32xf32>, vector<32x128xf32>, vector<2x128xf32> -> vector<2x128xf32>
    %312 = arith.addf %310, %311 : vector<2x128xf32>
    %313 = vector.broadcast %223 : vector<1x128xf32> to vector<2x128xf32>
    %314 = arith.addf %312, %313 : vector<2x128xf32>
    %315 = arith.negf %314 : vector<2x128xf32>
    %316 = math.exp %315 : vector<2x128xf32>
    %cst_99 = arith.constant 1.000000e+00 : f32
    %317 = vector.broadcast %cst_99 : f32 to vector<2x128xf32>
    %318 = arith.addf %317, %316 : vector<2x128xf32>
    %319 = arith.divf %317, %318 : vector<2x128xf32>
    %320 = vector.extract_strided_slice %319 {offsets = [0, 0], sizes = [2, 32], strides = [1, 1]} : vector<2x128xf32> to vector<2x32xf32>
    %321 = vector.extract_strided_slice %319 {offsets = [0, 32], sizes = [2, 32], strides = [1, 1]} : vector<2x128xf32> to vector<2x32xf32>
    %322 = vector.extract_strided_slice %319 {offsets = [0, 96], sizes = [2, 32], strides = [1, 1]} : vector<2x128xf32> to vector<2x32xf32>
    %323 = vector.extract_strided_slice %314 {offsets = [0, 64], sizes = [2, 32], strides = [1, 1]} : vector<2x128xf32> to vector<2x32xf32>
    %324 = math.tanh %323 : vector<2x32xf32>
    %325 = arith.mulf %321, %300 : vector<2x32xf32>
    %326 = arith.mulf %320, %324 : vector<2x32xf32>
    %327 = arith.addf %325, %326 : vector<2x32xf32>
    %328 = math.tanh %327 : vector<2x32xf32>
    %329 = arith.mulf %322, %328 : vector<2x32xf32>
    %330 = arith.index_cast %c3_i32_94 : i32 to index
    %c0_100 = arith.constant 0 : index
    %c0_101 = arith.constant 0 : index
    %331 = vector.load %arg10[%330, %c0_100, %c0_101] : memref<8x2x32xf32, #tpu.memory_space<vmem>>, vector<1x2x32xf32>
    %332 = vector.shape_cast %331 : vector<1x2x32xf32> to vector<2x32xf32>
    %333 = vector.shape_cast %329 : vector<2x32xf32> to vector<1x2x32xf32>
    tpu.vector_store %arg10[%330, %c0_100, %c0_101], %333 {strides = array<i32>} : memref<8x2x32xf32, #tpu.memory_space<vmem>>, vector<1x2x32xf32>,
    %c4_i32_102 = arith.constant 4 : i32
    %334 = arith.index_cast %c4_i32_102 : i32 to index
    %c0_103 = arith.constant 0 : index
    %c0_104 = arith.constant 0 : index
    %335 = vector.load %arg10[%334, %c0_103, %c0_104] : memref<8x2x32xf32, #tpu.memory_space<vmem>>, vector<1x2x32xf32>
    %336 = vector.shape_cast %335 : vector<1x2x32xf32> to vector<2x32xf32>
    %cst_105 = arith.constant dense<0.000000e+00> : vector<2x128xf32>
    %337 = tpu.matmul %336, %221, %cst_105 {dimension_numbers = #tpu.dot_dimension_numbers<[1], [0], [0], [1], [0, 0, 1, 1], [], []>} : vector<2x32xf32>, vector<32x128xf32>, vector<2x128xf32> -> vector<2x128xf32>
    %cst_106 = arith.constant dense<0.000000e+00> : vector<2x128xf32>
    %338 = tpu.matmul %329, %222, %cst_106 {dimension_numbers = #tpu.dot_dimension_numbers<[1], [0], [0], [1], [0, 0, 1, 1], [], []>} : vector<2x32xf32>, vector<32x128xf32>, vector<2x128xf32> -> vector<2x128xf32>
    %339 = arith.addf %337, %338 : vector<2x128xf32>
    %340 = vector.broadcast %223 : vector<1x128xf32> to vector<2x128xf32>
    %341 = arith.addf %339, %340 : vector<2x128xf32>
    %342 = arith.negf %341 : vector<2x128xf32>
    %343 = math.exp %342 : vector<2x128xf32>
    %cst_107 = arith.constant 1.000000e+00 : f32
    %344 = vector.broadcast %cst_107 : f32 to vector<2x128xf32>
    %345 = arith.addf %344, %343 : vector<2x128xf32>
    %346 = arith.divf %344, %345 : vector<2x128xf32>
    %347 = vector.extract_strided_slice %346 {offsets = [0, 0], sizes = [2, 32], strides = [1, 1]} : vector<2x128xf32> to vector<2x32xf32>
    %348 = vector.extract_strided_slice %346 {offsets = [0, 32], sizes = [2, 32], strides = [1, 1]} : vector<2x128xf32> to vector<2x32xf32>
    %349 = vector.extract_strided_slice %346 {offsets = [0, 96], sizes = [2, 32], strides = [1, 1]} : vector<2x128xf32> to vector<2x32xf32>
    %350 = vector.extract_strided_slice %341 {offsets = [0, 64], sizes = [2, 32], strides = [1, 1]} : vector<2x128xf32> to vector<2x32xf32>
    %351 = math.tanh %350 : vector<2x32xf32>
    %352 = arith.mulf %348, %327 : vector<2x32xf32>
    %353 = arith.mulf %347, %351 : vector<2x32xf32>
    %354 = arith.addf %352, %353 : vector<2x32xf32>
    %355 = math.tanh %354 : vector<2x32xf32>
    %356 = arith.mulf %349, %355 : vector<2x32xf32>
    %357 = arith.index_cast %c4_i32_102 : i32 to index
    %c0_108 = arith.constant 0 : index
    %c0_109 = arith.constant 0 : index
    %358 = vector.load %arg10[%357, %c0_108, %c0_109] : memref<8x2x32xf32, #tpu.memory_space<vmem>>, vector<1x2x32xf32>
    %359 = vector.shape_cast %358 : vector<1x2x32xf32> to vector<2x32xf32>
    %360 = vector.shape_cast %356 : vector<2x32xf32> to vector<1x2x32xf32>
    tpu.vector_store %arg10[%357, %c0_108, %c0_109], %360 {strides = array<i32>} : memref<8x2x32xf32, #tpu.memory_space<vmem>>, vector<1x2x32xf32>,
    %c5_i32_110 = arith.constant 5 : i32
    %361 = arith.index_cast %c5_i32_110 : i32 to index
    %c0_111 = arith.constant 0 : index
    %c0_112 = arith.constant 0 : index
    %362 = vector.load %arg10[%361, %c0_111, %c0_112] : memref<8x2x32xf32, #tpu.memory_space<vmem>>, vector<1x2x32xf32>
    %363 = vector.shape_cast %362 : vector<1x2x32xf32> to vector<2x32xf32>
    %cst_113 = arith.constant dense<0.000000e+00> : vector<2x128xf32>
    %364 = tpu.matmul %363, %221, %cst_113 {dimension_numbers = #tpu.dot_dimension_numbers<[1], [0], [0], [1], [0, 0, 1, 1], [], []>} : vector<2x32xf32>, vector<32x128xf32>, vector<2x128xf32> -> vector<2x128xf32>
    %cst_114 = arith.constant dense<0.000000e+00> : vector<2x128xf32>
    %365 = tpu.matmul %356, %222, %cst_114 {dimension_numbers = #tpu.dot_dimension_numbers<[1], [0], [0], [1], [0, 0, 1, 1], [], []>} : vector<2x32xf32>, vector<32x128xf32>, vector<2x128xf32> -> vector<2x128xf32>
    %366 = arith.addf %364, %365 : vector<2x128xf32>
    %367 = vector.broadcast %223 : vector<1x128xf32> to vector<2x128xf32>
    %368 = arith.addf %366, %367 : vector<2x128xf32>
    %369 = arith.negf %368 : vector<2x128xf32>
    %370 = math.exp %369 : vector<2x128xf32>
    %cst_115 = arith.constant 1.000000e+00 : f32
    %371 = vector.broadcast %cst_115 : f32 to vector<2x128xf32>
    %372 = arith.addf %371, %370 : vector<2x128xf32>
    %373 = arith.divf %371, %372 : vector<2x128xf32>
    %374 = vector.extract_strided_slice %373 {offsets = [0, 0], sizes = [2, 32], strides = [1, 1]} : vector<2x128xf32> to vector<2x32xf32>
    %375 = vector.extract_strided_slice %373 {offsets = [0, 32], sizes = [2, 32], strides = [1, 1]} : vector<2x128xf32> to vector<2x32xf32>
    %376 = vector.extract_strided_slice %373 {offsets = [0, 96], sizes = [2, 32], strides = [1, 1]} : vector<2x128xf32> to vector<2x32xf32>
    %377 = vector.extract_strided_slice %368 {offsets = [0, 64], sizes = [2, 32], strides = [1, 1]} : vector<2x128xf32> to vector<2x32xf32>
    %378 = math.tanh %377 : vector<2x32xf32>
    %379 = arith.mulf %375, %354 : vector<2x32xf32>
    %380 = arith.mulf %374, %378 : vector<2x32xf32>
    %381 = arith.addf %379, %380 : vector<2x32xf32>
    %382 = math.tanh %381 : vector<2x32xf32>
    %383 = arith.mulf %376, %382 : vector<2x32xf32>
    %384 = arith.index_cast %c5_i32_110 : i32 to index
    %c0_116 = arith.constant 0 : index
    %c0_117 = arith.constant 0 : index
    %385 = vector.load %arg10[%384, %c0_116, %c0_117] : memref<8x2x32xf32, #tpu.memory_space<vmem>>, vector<1x2x32xf32>
    %386 = vector.shape_cast %385 : vector<1x2x32xf32> to vector<2x32xf32>
    %387 = vector.shape_cast %383 : vector<2x32xf32> to vector<1x2x32xf32>
    tpu.vector_store %arg10[%384, %c0_116, %c0_117], %387 {strides = array<i32>} : memref<8x2x32xf32, #tpu.memory_space<vmem>>, vector<1x2x32xf32>,
    %c6_i32_118 = arith.constant 6 : i32
    %388 = arith.index_cast %c6_i32_118 : i32 to index
    %c0_119 = arith.constant 0 : index
    %c0_120 = arith.constant 0 : index
    %389 = vector.load %arg10[%388, %c0_119, %c0_120] : memref<8x2x32xf32, #tpu.memory_space<vmem>>, vector<1x2x32xf32>
    %390 = vector.shape_cast %389 : vector<1x2x32xf32> to vector<2x32xf32>
    %cst_121 = arith.constant dense<0.000000e+00> : vector<2x128xf32>
    %391 = tpu.matmul %390, %221, %cst_121 {dimension_numbers = #tpu.dot_dimension_numbers<[1], [0], [0], [1], [0, 0, 1, 1], [], []>} : vector<2x32xf32>, vector<32x128xf32>, vector<2x128xf32> -> vector<2x128xf32>
    %cst_122 = arith.constant dense<0.000000e+00> : vector<2x128xf32>
    %392 = tpu.matmul %383, %222, %cst_122 {dimension_numbers = #tpu.dot_dimension_numbers<[1], [0], [0], [1], [0, 0, 1, 1], [], []>} : vector<2x32xf32>, vector<32x128xf32>, vector<2x128xf32> -> vector<2x128xf32>
    %393 = arith.addf %391, %392 : vector<2x128xf32>
    %394 = vector.broadcast %223 : vector<1x128xf32> to vector<2x128xf32>
    %395 = arith.addf %393, %394 : vector<2x128xf32>
    %396 = arith.negf %395 : vector<2x128xf32>
    %397 = math.exp %396 : vector<2x128xf32>
    %cst_123 = arith.constant 1.000000e+00 : f32
    %398 = vector.broadcast %cst_123 : f32 to vector<2x128xf32>
    %399 = arith.addf %398, %397 : vector<2x128xf32>
    %400 = arith.divf %398, %399 : vector<2x128xf32>
    %401 = vector.extract_strided_slice %400 {offsets = [0, 0], sizes = [2, 32], strides = [1, 1]} : vector<2x128xf32> to vector<2x32xf32>
    %402 = vector.extract_strided_slice %400 {offsets = [0, 32], sizes = [2, 32], strides = [1, 1]} : vector<2x128xf32> to vector<2x32xf32>
    %403 = vector.extract_strided_slice %400 {offsets = [0, 96], sizes = [2, 32], strides = [1, 1]} : vector<2x128xf32> to vector<2x32xf32>
    %404 = vector.extract_strided_slice %395 {offsets = [0, 64], sizes = [2, 32], strides = [1, 1]} : vector<2x128xf32> to vector<2x32xf32>
    %405 = math.tanh %404 : vector<2x32xf32>
    %406 = arith.mulf %402, %381 : vector<2x32xf32>
    %407 = arith.mulf %401, %405 : vector<2x32xf32>
    %408 = arith.addf %406, %407 : vector<2x32xf32>
    %409 = math.tanh %408 : vector<2x32xf32>
    %410 = arith.mulf %403, %409 : vector<2x32xf32>
    %411 = arith.index_cast %c6_i32_118 : i32 to index
    %c0_124 = arith.constant 0 : index
    %c0_125 = arith.constant 0 : index
    %412 = vector.load %arg10[%411, %c0_124, %c0_125] : memref<8x2x32xf32, #tpu.memory_space<vmem>>, vector<1x2x32xf32>
    %413 = vector.shape_cast %412 : vector<1x2x32xf32> to vector<2x32xf32>
    %414 = vector.shape_cast %410 : vector<2x32xf32> to vector<1x2x32xf32>
    tpu.vector_store %arg10[%411, %c0_124, %c0_125], %414 {strides = array<i32>} : memref<8x2x32xf32, #tpu.memory_space<vmem>>, vector<1x2x32xf32>,
    %c7_i32_126 = arith.constant 7 : i32
    %415 = arith.index_cast %c7_i32_126 : i32 to index
    %c0_127 = arith.constant 0 : index
    %c0_128 = arith.constant 0 : index
    %416 = vector.load %arg10[%415, %c0_127, %c0_128] : memref<8x2x32xf32, #tpu.memory_space<vmem>>, vector<1x2x32xf32>
    %417 = vector.shape_cast %416 : vector<1x2x32xf32> to vector<2x32xf32>
    %cst_129 = arith.constant dense<0.000000e+00> : vector<2x128xf32>
    %418 = tpu.matmul %417, %221, %cst_129 {dimension_numbers = #tpu.dot_dimension_numbers<[1], [0], [0], [1], [0, 0, 1, 1], [], []>} : vector<2x32xf32>, vector<32x128xf32>, vector<2x128xf32> -> vector<2x128xf32>
    %cst_130 = arith.constant dense<0.000000e+00> : vector<2x128xf32>
    %419 = tpu.matmul %410, %222, %cst_130 {dimension_numbers = #tpu.dot_dimension_numbers<[1], [0], [0], [1], [0, 0, 1, 1], [], []>} : vector<2x32xf32>, vector<32x128xf32>, vector<2x128xf32> -> vector<2x128xf32>
    %420 = arith.addf %418, %419 : vector<2x128xf32>
    %421 = vector.broadcast %223 : vector<1x128xf32> to vector<2x128xf32>
    %422 = arith.addf %420, %421 : vector<2x128xf32>
    %423 = arith.negf %422 : vector<2x128xf32>
    %424 = math.exp %423 : vector<2x128xf32>
    %cst_131 = arith.constant 1.000000e+00 : f32
    %425 = vector.broadcast %cst_131 : f32 to vector<2x128xf32>
    %426 = arith.addf %425, %424 : vector<2x128xf32>
    %427 = arith.divf %425, %426 : vector<2x128xf32>
    %428 = vector.extract_strided_slice %427 {offsets = [0, 0], sizes = [2, 32], strides = [1, 1]} : vector<2x128xf32> to vector<2x32xf32>
    %429 = vector.extract_strided_slice %427 {offsets = [0, 32], sizes = [2, 32], strides = [1, 1]} : vector<2x128xf32> to vector<2x32xf32>
    %430 = vector.extract_strided_slice %427 {offsets = [0, 96], sizes = [2, 32], strides = [1, 1]} : vector<2x128xf32> to vector<2x32xf32>
    %431 = vector.extract_strided_slice %422 {offsets = [0, 64], sizes = [2, 32], strides = [1, 1]} : vector<2x128xf32> to vector<2x32xf32>
    %432 = math.tanh %431 : vector<2x32xf32>
    %433 = arith.mulf %429, %408 : vector<2x32xf32>
    %434 = arith.mulf %428, %432 : vector<2x32xf32>
    %435 = arith.addf %433, %434 : vector<2x32xf32>
    %436 = math.tanh %435 : vector<2x32xf32>
    %437 = arith.mulf %430, %436 : vector<2x32xf32>
    %438 = arith.index_cast %c7_i32_126 : i32 to index
    %c0_132 = arith.constant 0 : index
    %c0_133 = arith.constant 0 : index
    %439 = vector.load %arg10[%438, %c0_132, %c0_133] : memref<8x2x32xf32, #tpu.memory_space<vmem>>, vector<1x2x32xf32>
    %440 = vector.shape_cast %439 : vector<1x2x32xf32> to vector<2x32xf32>
    %441 = vector.shape_cast %437 : vector<2x32xf32> to vector<1x2x32xf32>
    tpu.vector_store %arg10[%438, %c0_132, %c0_133], %441 {strides = array<i32>} : memref<8x2x32xf32, #tpu.memory_space<vmem>>, vector<1x2x32xf32>,
    %c8_i32_134 = arith.constant 8 : i32
    %c0_135 = arith.constant 0 : index
    %c0_136 = arith.constant 0 : index
    %442 = vector.load %arg7[%c0_135, %c0_136] : memref<1x32xf32, #tpu.memory_space<vmem>>, vector<1x32xf32>
    %c0_137 = arith.constant 0 : index
    %c0_138 = arith.constant 0 : index
    %c0_139 = arith.constant 0 : index
    %443 = vector.load %arg10[%c0_137, %c0_138, %c0_139] : memref<8x2x32xf32, #tpu.memory_space<vmem>>, vector<8x2x32xf32>
    %444 = vector.shape_cast %442 : vector<1x32xf32> to vector<1x1x32xf32>
    %445 = vector.broadcast %444 : vector<1x1x32xf32> to vector<8x2x32xf32>
    %446 = arith.mulf %443, %445 : vector<8x2x32xf32>
    %cst_140 = arith.constant dense<0.000000e+00> : vector<8x2xf32>
    %447 = vector.multi_reduction <add>, %446, %cst_140 [2] : vector<8x2x32xf32> to vector<8x2xf32>
    %c0_141 = arith.constant 0 : index
    %c0_142 = arith.constant 0 : index
    %448 = memref.load %arg8[%c0_141, %c0_142] : memref<1x1xf32, #tpu.memory_space<smem>>
    %449 = vector.broadcast %448 : f32 to vector<8x2xf32>
    %450 = arith.addf %447, %449 : vector<8x2xf32>
    %451 = arith.negf %450 : vector<8x2xf32>
    %452 = math.exp %451 : vector<8x2xf32>
    %cst_143 = arith.constant 1.000000e+00 : f32
    %453 = vector.broadcast %cst_143 : f32 to vector<8x2xf32>
    %454 = arith.addf %453, %452 : vector<8x2xf32>
    %455 = arith.divf %453, %454 : vector<8x2xf32>
    %c0_144 = arith.constant 0 : index
    %c0_145 = arith.constant 0 : index
    %456 = vector.load %arg9[%c0_144, %c0_145] : memref<8x2xf32, #tpu.memory_space<vmem>>, vector<8x2xf32>
    tpu.vector_store %arg9[%c0_144, %c0_145], %455 {strides = array<i32>} : memref<8x2xf32, #tpu.memory_space<vmem>>, vector<8x2xf32>,
    return
  }
}

</mosaic_0001>

<bundles_post_ra>
// kernel: tpu_custom_call.1
= control target key start
LH: loop header
LB: loop body
LE: loop exit
PB: predicated region body
PF: predicated region fallthrough
CT: control target
= control target key end

     0   :  { %15 = vsyncpa [#allocation5], 0  ;;  %s4500_s0 = inlined_call_operand.vmem [shape: f32[8,2,4], index: 0, kind: input, shape index: {}]   ;;  %s4501_s1 = inlined_call_operand.hbm [shape: f32[4,128], index: 1, kind: input, shape index: {}]   ;;  %s4502_s2 = inlined_call_operand.vmem [shape: f32[32,128], index: 2, kind: input, shape index: {}]   ;;  %s4503_s3 = inlined_call_operand.vmem [shape: f32[1,128], index: 3, kind: input, shape index: {}]   ;;  %s4504_s4 = inlined_call_operand.hbm [shape: f32[32,128], index: 4, kind: input, shape index: {}]   ;;  %s4505_s5 = inlined_call_operand.hbm [shape: f32[32,128], index: 5, kind: input, shape index: {}]   ;;  %s4506_s6 = inlined_call_operand.vmem [shape: f32[1,128], index: 6, kind: input, shape index: {}]   ;;  %s4507_s7 = inlined_call_operand.vmem [shape: f32[1,32], index: 7, kind: input, shape index: {}]   ;;  %s4508_s8 = inlined_call_operand.<no memory space> [shape: f32[1,1], index: 8, kind: input, shape index: {}]   ;;  %s4509_s9 = inlined_call_operand.vmem [shape: f32[8,2], index: 9, kind: output, shape index: {}]  }
   0x1   :  { %16 = vsyncpa [#allocation7], 0  ;;  %s4002_s30 = smov [#allocation6]   ;;  %s3932_s13 = scalar_lea.hbm %s4504_s4, 512 }
   0x2   :  { %s38_s10 = sshll.u32 %s4002_s30, 4  ;;  %p3933_p0 = scmp.ne.s32.totalorder %s4504_s4, %s3932_s13  ;;  %s39_s10 = int_to_ptr.vmem [resolvable:$true] %s38_s10 }
   0x3   :  { %p3936_p1 = scmp.lt.u32.totalorder %s3932_s13, %s4504_s4 }
   0x5   :  { %p3938_p2 = pnand %p3936_p1, %p3933_p0 }
   0x7   :  { %3941 = shalt.err (!%p3938_p2)
}
   0x8   :  { %s3942_s18 = scalar_lea.vmem %s39_s10, 512  ;;  %p3947_p4 = scmp.lt.s32.totalorder %s39_s10, %s39_s10 }
   0x9   :  { %p3943_p3 = scmp.ne.s32.totalorder %s39_s10, %s3942_s18  ;;  %p3948_p5 = scmp.lt.s32.totalorder %s3942_s18, %s3942_s18 }
   0xb   :  { %p3949_p6 = por %p3948_p5, %p3947_p4 }
   0xd   :  { %p3950_p7 = pnand %p3949_p6, %p3943_p3 }
   0xf   :  { %3953 = shalt.err (!%p3950_p7)
}
  0x10   :  { %s4003_s19 = smov 128   ;;  %s4004_s20 = smov 8  }
  0x11   :  { %44 = dma.hbm_to_vmem [thread:$0]  %s4504_s4, 512, %s39_s10, [#allocation7], %s4003_s19, %s4003_s19, %s4004_s20  }
  0x12   :  { %s4005_s23 = smov [#allocation4]   ;;  %s4006_s25 = smov [#allocation8]  }
  0x13   :  { %s25_s24 = sshll.u32 %s4005_s23, 4  ;;  %s50_s26 = sshll.u32 %s4006_s25, 4  ;;  %s26_s24 = int_to_ptr.vmem [resolvable:$true] %s25_s24  ;;  %s51_s26 = int_to_ptr.vmem [resolvable:$true] %s50_s26 }
  0x14   :  { %s3954_s29 = scalar_lea.hbm %s4501_s1, 64 }
  0x15   :  { %p3955_p8 = scmp.ne.s32.totalorder %s4501_s1, %s3954_s29  ;;  %p3958_p9 = scmp.lt.u32.totalorder %s3954_s29, %s4501_s1 }
  0x17   :  { %p3960_p10 = pnand %p3958_p9, %p3955_p8 }
  0x19   :  { %3963 = shalt.err (!%p3960_p10)
}
  0x1a   :  { %s3964_s4 = scalar_lea.vmem %s26_s24, 64  ;;  %p3969_p12 = scmp.lt.s32.totalorder %s26_s24, %s26_s24 }
  0x1b   :  { %p3965_p11 = scmp.ne.s32.totalorder %s26_s24, %s3964_s4  ;;  %p3970_p13 = scmp.lt.s32.totalorder %s3964_s4, %s3964_s4 }
  0x1d   :  { %p3971_p0 = por %p3970_p13, %p3969_p12 }
  0x1f   :  { %p3972_p1 = pnand %p3971_p0, %p3965_p11 }
  0x21   :  { %3975 = shalt.err (!%p3972_p1)
}
  0x22   :  { %28 = dma.hbm_to_vmem [thread:$0]  %s4501_s1, 64, %s26_s24, [#allocation5]  }
  0x23   :  { %s3976_s17 = scalar_lea.hbm %s4505_s5, 512 }
  0x24   :  { %p3977_p2 = scmp.ne.s32.totalorder %s4505_s5, %s3976_s17  ;;  %p3980_p3 = scmp.lt.u32.totalorder %s3976_s17, %s4505_s5 }
  0x26   :  { %p3982_p4 = pnand %p3980_p3, %p3977_p2 }
  0x28   :  { %3985 = shalt.err (!%p3982_p4)
}
  0x29   :  { %s3986_s25 = scalar_lea.vmem %s51_s26, 512  ;;  %p3991_p6 = scmp.lt.s32.totalorder %s51_s26, %s51_s26 }
  0x2a   :  { %p3987_p5 = scmp.ne.s32.totalorder %s51_s26, %s3986_s25  ;;  %p3992_p7 = scmp.lt.s32.totalorder %s3986_s25, %s3986_s25 }
  0x2c   :  { %p3993_p8 = por %p3992_p7, %p3991_p6 }
  0x2e   :  { %p3994_p9 = pnand %p3993_p8, %p3987_p5 }
  0x30   :  { %3997 = shalt.err (!%p3994_p9)
}
  0x31   :  { %56 = dma.hbm_to_vmem [thread:$0]  %s4505_s5, 512, %s51_s26, [#allocation7], %s4003_s19, %s4003_s19, %s4004_s20  }
  0x32   :  { %3998 = dma.done.wait [#allocation5], 64  }
  0x33   :  { %3999 = vsyncadd [#allocation5], 4294967232 }
  0x34   :  { %4000 = dma.done.wait [#allocation7], 1024  }
  0x35   :  { %4001 = vsyncadd [#allocation7], 4294966272  ;;  %v4007_v0 = vmov 0.0|0.0   ;;  %v4008_v1 = vmov 0.0   ;;  %vm4009_vm0 = vmmov 0   ;;  %vm157_vm1 = vcmask 1043456  }
  0x36   :  { %3617 = vmatprep.subr.bf16.mxu0 %v4007_v0  ;;  %3324 = vmatprep.subr.mxu1 %v4008_v1  ;;  %v73_v2 = vld [vmem:[%s4502_s2] sm:$0xff]  ;;  %v74_v3 = vld [vmem:[%s4502_s2 + $0x8] sm:$0xff]  ;;  %v75_v4 = vld [vmem:[%s4502_s2 + $0x10] sm:$0xff]  ;;  %vm153_vm2 = vcmask 31744   ;;  %s4010_s4 = smov 64   ;;  %s4011_s10 = smov 32  }
  0x37   :  { %3326 = vmatprep.mubr.msk.f32.mxu1 %vm4009_vm0, %v4008_v1  ;;  %3321 = vmatprep.mubr.msk.f32.mxu0 %vm4009_vm0, %v4008_v1  ;;  %v4119_v5 = vpack.c.bf16 %v74_v3, %v73_v2  ;;  %v76_v6 = vld [vmem:[%s4502_s2 + $0x18] sm:$0xff]  ;;  %v4124_v7 = vld [vmem:[#allocation4] sm:$0xf]  ;;  %v78_v8 = vld [vmem:[%s4500_s0] sm:$0x3]  ;;  %vm266_vm3 = vcmask 254976  }
  0x38   :  { %3325 = vmatpush3.msk.msra.mxu1 %vm157_vm1, %v4124_v7  ;;  %v4132_v9 = vpack.c.bf16 %v76_v6, %v75_v4  ;;  %v4154_v12 = vld [vmem:[%s4503_s3] ss:$0 sm:$0xff]  ;;  %v3109_v27 = vld [vmem:[%s4500_s0 + $0x2] sm:$0x3]  ;;  %vm79_vm4 = vcmask 261120   ;;  %vm3082_vm5 = vcmask 1041409  }
  0x39   :  { %3619 = vmatpush3.bf16.msra.mxu0 %v4119_v5  ;;  %3327 = vmatmul.mubr.msk.f32.vlgmr.msra.gmra.mrb[0].mxu1 %vm153_vm2, %v78_v8  ;;  %v3114_v48 = vld [vmem:[%s4500_s0 + $0x4] sm:$0x3]  ;;  %vm3084_vm6 = vcmask 1042434   ;;  %vm3086_vm7 = vcmask 1043459   ;;  %vm3088_vm8 = vcmask 1044484   ;;  %vm3090_vm9 = vcmask 1045509  }
  0x3a   :  { %3620 = vmatprep.subr.bf16.mxu0 %v4007_v0  ;;  %3623 = vmatprep.subr.bf16.mxu1 %v4007_v0  ;;  %vm3092_vm10 = vcmask 1046534   ;;  %vm3094_vm11 = vcmask 1047559   ;;  %vm3097_vm12 = vcmask 15360  }
  0x3b   :  { %3625 = vmatpush3.bf16.msra.mxu1 %v4119_v5  ;;  %3337 = vmatprep.mubr.msk.f32.mxu1 %vm4009_vm0, %v4008_v1 }
  0x3c   :  { %3626 = vmatprep.subr.bf16.mxu1 %v4007_v0 }
  0x3d   :  { %3622 = vmatpush3.bf16.msra.mxu0 %v4132_v9 }
  0x3e   :  { %3340 = vmatprep.subr.mxu0 %v4008_v1 }
  0x3f   :  { %3628 = vmatpush3.bf16.msra.mxu1 %v4132_v9 }
  0x40   :  { %3322 = vmatmul.mubr.f32.vlgmr.msra.gmra.mrb[0].mxu0 %v4008_v1  ;;  %3629 = vmatprep.subr.bf16.mxu1 %v4007_v0 }
  0x41   :  { %3341 = vmatpush3.msk.msra.mxu0 %vm157_vm1, %v4124_v7  ;;  %3342 = vmatprep.mubr.msk.f32.mxu0 %vm4009_vm0, %v4008_v1 }
  0x42   :  { %3356 = vmatprep.subr.mxu0 %v4008_v1 }
  0x44   :  { %3343 = vmatmul.mubr.msk.f32.vlgmr.msra.gmra.mrb[2].mxu0 %vm153_vm2, %v3109_v27 }
  0x45   :  { %3357 = vmatpush3.msk.msra.mxu0 %vm157_vm1, %v4124_v7  ;;  %3358 = vmatprep.mubr.msk.f32.mxu0 %vm4009_vm0, %v4008_v1 }
  0x46   :  { %3635 = vmatprep.subr.bf16.mxu0 %v4007_v0 }
  0x48   :  { %3359 = vmatmul.mubr.msk.f32.vlgmr.msra.gmra.mrb[4].mxu0 %vm153_vm2, %v3114_v48 }
  0x49   :  { %3637 = vmatpush3.bf16.msra.mxu0 %v4119_v5  ;;  %3369 = vmatprep.mubr.msk.f32.mxu0 %vm4009_vm0, %v4008_v1 }
  0x4a   :  { %3638 = vmatprep.subr.bf16.mxu0 %v4007_v0 }
  0x4d   :  { %3640 = vmatpush3.bf16.msra.mxu0 %v4132_v9 }
  0x4e   :  { %3388 = vmatprep.subr.mxu0 %v4008_v1 }
 0x10c   :  { %v227_v10 = vpop.f32.mrb[0].mxu1 }
 0x10d   :  { %v3328_v11 = vpop.f32.mrb[1].mxu1 }
 0x113   :  { %v149_v13 = vpop.f32.mrb[0].mxu0 }
 0x114   :  { %v228_v14 = vadd.f32 %v227_v10, %v149_v13  ;;  %v3323_v15 = vpop.f32.mrb[1].mxu0  ;;  %v3119_v10 = vld [vmem:[%s4500_s0 + $0x6] sm:$0x3] }
 0x116   :  { %v237_v16 = vadd.f32 %v4154_v12, %v228_v14 }
 0x117   :  { %v411_v31 = vpop.f32.mrb[2].mxu0 }
 0x118   :  { %3771 = vtanh.f32 %v237_v16  ;;  %v3108_v18 = vmul.f32 -1.442695, %v237_v16  ;;  %v3344_v32 = vpop.f32.mrb[3].mxu0 }
 0x119   :  { %v3124_v32 = vld [vmem:[%s4500_s0 + $0x8] sm:$0x3] }
 0x11a   :  { %3773 = vpow2.f32 %v3108_v18 }
 0x11b   :  { %v589_v52 = vpop.f32.mrb[4].mxu0 }
 0x11c   :  { %v3360_v53 = vpop.f32.mrb[5].mxu0 }
 0x11d   :  { %v3129_v53 = vld [vmem:[%s4500_s0 + $0xa] sm:$0x3] }
 0x122   :  { %v3772_v17 = vpop.eup %3771 }
 0x123   :  { %247 = vrot.lane.b32.xlu0 %v3772_v17, %s4010_s4 }
 0x124   :  { %v3774_v19 = vpop.eup %3773 }
 0x125   :  { %v241_v20 = vadd.f32 1.0, %v3774_v19 }
 0x127   :  { %3775 = vrcp.f32 %v241_v20 }
 0x131   :  { %v3776_v21 = vpop.eup %3775 }
 0x132   :  { %v245_v24 = vmul.f32 0.0, %v3776_v21 }
 0x195   :  { %v248_v22 = vpop.permute.xlu0 %247 }
 0x196   :  { %v250_v23 = vmul.f32 %v3776_v21, %v248_v22 }
 0x198   :  { %252 = vrot.lane.b32.xlu0 %v250_v23, %s4011_s10 }
 0x20a   :  { %v253_v25 = vpop.permute.xlu0 %252 }
 0x20b   :  { %v255_v26 = vadd.f32 %v253_v25, %v245_v24 }
 0x20d   :  { %3777 = vtanh.f32 %v255_v26 }
 0x217   :  { %v3778_v28 = vpop.eup %3777 }
 0x218   :  { %258 = vrot.lane.b32.xlu1 %v3778_v28, %s4010_s4 }
 0x28a   :  { %v259_v29 = vpop.permute.xlu1 %258 }
 0x28b   :  { %v261_v30 = vmul.f32 %v3776_v21, %v259_v29 }
 0x28d   :  { %263 = vrot.lane.b32.xlu1 %v261_v30, %s4011_s10 }
 0x2ff   :  { %v264_v33 = vpop.permute.xlu1 %263 }
 0x300   :  { %267 = vst.msk [vmem:[#allocation2] sm:$0x3] %vm266_vm3, %v264_v33  ;;  %3338 = vmatmul.mubr.msk.f32.vlgmr.msra.gmra.mrb[2].mxu1 %vm79_vm4, %v264_v33 }
 0x301   :  { %3631 = vmatpush3.bf16.msra.mxu1 %v4119_v5  ;;  %3353 = vmatprep.mubr.msk.f32.mxu1 %vm4009_vm0, %v4008_v1 }
 0x302   :  { %3632 = vmatprep.subr.bf16.mxu1 %v4007_v0 }
 0x305   :  { %3634 = vmatpush3.bf16.msra.mxu1 %v4132_v9 }
 0x306   :  { %3372 = vmatprep.subr.mxu1 %v4008_v1 }
 0x3d3   :  { %v338_v34 = vpop.f32.mrb[2].mxu1 }
 0x3d4   :  { %v412_v35 = vadd.f32 %v411_v31, %v338_v34  ;;  %v3339_v36 = vpop.f32.mrb[3].mxu1 }
 0x3d6   :  { %v415_v37 = vadd.f32 %v4154_v12, %v412_v35 }
 0x3d8   :  { %3779 = vtanh.f32 %v415_v37  ;;  %v3113_v39 = vmul.f32 -1.442695, %v415_v37 }
 0x3da   :  { %3781 = vpow2.f32 %v3113_v39 }
 0x3e2   :  { %v3780_v38 = vpop.eup %3779 }
 0x3e3   :  { %425 = vrot.lane.b32.xlu0 %v3780_v38, %s4010_s4 }
 0x3e4   :  { %v3782_v40 = vpop.eup %3781 }
 0x3e5   :  { %v419_v41 = vadd.f32 1.0, %v3782_v40 }
 0x3e7   :  { %3783 = vrcp.f32 %v419_v41 }
 0x3f1   :  { %v3784_v42 = vpop.eup %3783 }
 0x3f2   :  { %v423_v45 = vmul.f32 %v3784_v42, %v255_v26 }
 0x455   :  { %v426_v43 = vpop.permute.xlu0 %425 }
 0x456   :  { %v428_v44 = vmul.f32 %v3784_v42, %v426_v43 }
 0x458   :  { %430 = vrot.lane.b32.xlu1 %v428_v44, %s4011_s10 }
 0x4ca   :  { %v431_v46 = vpop.permute.xlu1 %430 }
 0x4cb   :  { %v433_v47 = vadd.f32 %v431_v46, %v423_v45 }
 0x4cd   :  { %3785 = vtanh.f32 %v433_v47 }
 0x4d7   :  { %v3786_v49 = vpop.eup %3785 }
 0x4d8   :  { %436 = vrot.lane.b32.xlu0 %v3786_v49, %s4010_s4 }
 0x54a   :  { %v437_v50 = vpop.permute.xlu0 %436 }
 0x54b   :  { %v439_v51 = vmul.f32 %v3784_v42, %v437_v50 }
 0x54d   :  { %441 = vrot.lane.b32.xlu1 %v439_v51, %s4011_s10 }
 0x5bf   :  { %v442_v54 = vpop.permute.xlu1 %441 }
 0x5c0   :  { %445 = vst.msk [vmem:[#allocation2 + $0x2] sm:$0x3] %vm266_vm3, %v442_v54  ;;  %3354 = vmatmul.mubr.msk.f32.vlgmr.msra.gmra.mrb[4].mxu1 %vm79_vm4, %v442_v54 }
 0x5c1   :  { %3373 = vmatpush3.msk.msra.mxu1 %vm157_vm1, %v4124_v7  ;;  %3374 = vmatprep.mubr.msk.f32.mxu1 %vm4009_vm0, %v4008_v1 }
 0x5c2   :  { %3641 = vmatprep.subr.bf16.mxu1 %v4007_v0 }
 0x5c4   :  { %3375 = vmatmul.mubr.msk.f32.vlgmr.msra.gmra.mrb[6].mxu1 %vm153_vm2, %v3119_v10 }
 0x5c5   :  { %3643 = vmatpush3.bf16.msra.mxu1 %v4119_v5  ;;  %3385 = vmatprep.mubr.msk.f32.mxu1 %vm4009_vm0, %v4008_v1 }
 0x5c6   :  { %3644 = vmatprep.subr.bf16.mxu1 %v4007_v0 }
 0x5c9   :  { %3646 = vmatpush3.bf16.msra.mxu1 %v4132_v9 }
 0x5ca   :  { %3404 = vmatprep.subr.mxu1 %v4008_v1 }
 0x693   :  { %v516_v55 = vpop.f32.mrb[4].mxu1 }
 0x694   :  { %v590_v56 = vadd.f32 %v589_v52, %v516_v55  ;;  %v3355_v57 = vpop.f32.mrb[5].mxu1 }
 0x696   :  { %v593_v58 = vadd.f32 %v4154_v12, %v590_v56 }
 0x697   :  { %v767_v15 = vpop.f32.mrb[6].mxu1 }
 0x698   :  { %3787 = vtanh.f32 %v593_v58  ;;  %v3118_v60 = vmul.f32 -1.442695, %v593_v58  ;;  %v3376_v16 = vpop.f32.mrb[7].mxu1 }
 0x699   :  { %v3134_v16 = vld [vmem:[%s4500_s0 + $0xc] sm:$0x3] }
 0x69a   :  { %3789 = vpow2.f32 %v3118_v60 }
 0x6a2   :  { %v3788_v59 = vpop.eup %3787 }
 0x6a3   :  { %603 = vrot.lane.b32.xlu0 %v3788_v59, %s4010_s4 }
 0x6a4   :  { %v3790_v61 = vpop.eup %3789 }
 0x6a5   :  { %v597_v62 = vadd.f32 1.0, %v3790_v61 }
 0x6a7   :  { %3791 = vrcp.f32 %v597_v62 }
 0x6b1   :  { %v3792_v63 = vpop.eup %3791 }
 0x6b2   :  { %v601_v4 = vmul.f32 %v3792_v63, %v433_v47 }
 0x715   :  { %v604_v2 = vpop.permute.xlu0 %603 }
 0x716   :  { %v606_v3 = vmul.f32 %v3792_v63, %v604_v2 }
 0x718   :  { %608 = vrot.lane.b32.xlu1 %v606_v3, %s4011_s10 }
 0x78a   :  { %v609_v6 = vpop.permute.xlu1 %608 }
 0x78b   :  { %v611_v8 = vadd.f32 %v609_v6, %v601_v4 }
 0x78d   :  { %3793 = vtanh.f32 %v611_v8 }
 0x797   :  { %v3794_v11 = vpop.eup %3793 }
 0x798   :  { %614 = vrot.lane.b32.xlu0 %v3794_v11, %s4010_s4 }
 0x80a   :  { %v615_v13 = vpop.permute.xlu0 %614 }
 0x80b   :  { %v617_v14 = vmul.f32 %v3792_v63, %v615_v13 }
 0x80d   :  { %619 = vrot.lane.b32.xlu1 %v617_v14, %s4011_s10 }
 0x87f   :  { %v620_v17 = vpop.permute.xlu1 %619 }
 0x880   :  { %623 = vst.msk [vmem:[#allocation2 + $0x4] sm:$0x3] %vm266_vm3, %v620_v17  ;;  %3370 = vmatmul.mubr.msk.f32.vlgmr.msra.gmra.mrb[6].mxu0 %vm79_vm4, %v620_v17 }
 0x881   :  { %3389 = vmatpush3.msk.msra.mxu0 %vm157_vm1, %v4124_v7  ;;  %3390 = vmatprep.mubr.msk.f32.mxu0 %vm4009_vm0, %v4008_v1 }
 0x882   :  { %3647 = vmatprep.subr.bf16.mxu0 %v4007_v0 }
 0x884   :  { %3391 = vmatmul.mubr.msk.f32.vlgmr.msra.gmra.mrb[8].mxu0 %vm153_vm2, %v3124_v32 }
 0x885   :  { %3649 = vmatpush3.bf16.msra.mxu0 %v4119_v5  ;;  %3401 = vmatprep.mubr.msk.f32.mxu0 %vm4009_vm0, %v4008_v1 }
 0x886   :  { %3650 = vmatprep.subr.bf16.mxu0 %v4007_v0 }
 0x889   :  { %3652 = vmatpush3.bf16.msra.mxu0 %v4132_v9 }
 0x88a   :  { %3420 = vmatprep.subr.mxu0 %v4008_v1 }
 0x953   :  { %v694_v18 = vpop.f32.mrb[6].mxu0 }
 0x954   :  { %v768_v19 = vadd.f32 %v767_v15, %v694_v18  ;;  %v3371_v20 = vpop.f32.mrb[7].mxu0 }
 0x956   :  { %v771_v21 = vadd.f32 %v4154_v12, %v768_v19 }
 0x957   :  { %v945_v36 = vpop.f32.mrb[8].mxu0 }
 0x958   :  { %3795 = vtanh.f32 %v771_v21  ;;  %v3123_v23 = vmul.f32 -1.442695, %v771_v21  ;;  %v3392_v37 = vpop.f32.mrb[9].mxu0 }
 0x95a   :  { %3797 = vpow2.f32 %v3123_v23 }
 0x962   :  { %v3796_v22 = vpop.eup %3795 }
 0x963   :  { %781 = vrot.lane.b32.xlu0 %v3796_v22, %s4010_s4 }
 0x964   :  { %v3798_v24 = vpop.eup %3797 }
 0x965   :  { %v775_v25 = vadd.f32 1.0, %v3798_v24 }
 0x967   :  { %3799 = vrcp.f32 %v775_v25 }
 0x971   :  { %v3800_v26 = vpop.eup %3799 }
 0x972   :  { %v779_v29 = vmul.f32 %v3800_v26, %v611_v8 }
 0x9d5   :  { %v782_v27 = vpop.permute.xlu0 %781 }
 0x9d6   :  { %v784_v28 = vmul.f32 %v3800_v26, %v782_v27 }
 0x9d8   :  { %786 = vrot.lane.b32.xlu1 %v784_v28, %s4011_s10 }
 0xa4a   :  { %v787_v30 = vpop.permute.xlu1 %786 }
 0xa4b   :  { %v789_v31 = vadd.f32 %v787_v30, %v779_v29 }
 0xa4d   :  { %3801 = vtanh.f32 %v789_v31 }
 0xa57   :  { %v3802_v33 = vpop.eup %3801 }
 0xa58   :  { %792 = vrot.lane.b32.xlu0 %v3802_v33, %s4010_s4 }
 0xaca   :  { %v793_v34 = vpop.permute.xlu0 %792 }
 0xacb   :  { %v795_v35 = vmul.f32 %v3800_v26, %v793_v34  ;;  %v1518_v34 = vld [vmem:[#allocation8] sm:$0xff] }
 0xacd   :  { %797 = vrot.lane.b32.xlu1 %v795_v35, %s4011_s10  ;;  %v1519_v35 = vld [vmem:[#allocation8 + $0x8] sm:$0xff] }
 0xb3f   :  { %v798_v38 = vpop.permute.xlu1 %797 }
 0xb40   :  { %801 = vst.msk [vmem:[#allocation2 + $0x6] sm:$0x3] %vm266_vm3, %v798_v38  ;;  %3386 = vmatmul.mubr.msk.f32.vlgmr.msra.gmra.mrb[8].mxu1 %vm79_vm4, %v798_v38  ;;  %v1520_v38 = vld [vmem:[#allocation8 + $0x10] sm:$0xff] }
 0xb41   :  { %3405 = vmatpush3.msk.msra.mxu1 %vm157_vm1, %v4124_v7  ;;  %3406 = vmatprep.mubr.msk.f32.mxu1 %vm4009_vm0, %v4008_v1 }
 0xb42   :  { %3653 = vmatprep.subr.bf16.mxu1 %v4007_v0 }
 0xb44   :  { %3407 = vmatmul.mubr.msk.f32.vlgmr.msra.gmra.mrb[10].mxu1 %vm153_vm2, %v3129_v53  ;;  %v1703_v53 = vld [vmem:[#allocation2 + $0x2] sm:$0x3] }
 0xb45   :  { %3655 = vmatpush3.bf16.msra.mxu1 %v4119_v5  ;;  %3417 = vmatprep.mubr.msk.f32.mxu1 %vm4009_vm0, %v4008_v1 }
 0xb46   :  { %3656 = vmatprep.subr.bf16.mxu1 %v4007_v0 }
 0xb49   :  { %3658 = vmatpush3.bf16.msra.mxu1 %v4132_v9 }
 0xb4a   :  { %3436 = vmatprep.subr.mxu1 %v4008_v1 }
 0xc13   :  { %v872_v39 = vpop.f32.mrb[8].mxu1 }
 0xc14   :  { %v946_v40 = vadd.f32 %v945_v36, %v872_v39  ;;  %v3387_v41 = vpop.f32.mrb[9].mxu1  ;;  %v4298_v36 = vpack.c.bf16 %v1519_v35, %v1518_v34  ;;  %v1521_v39 = vld [vmem:[#allocation8 + $0x18] sm:$0xff] }
 0xc16   :  { %v949_v42 = vadd.f32 %v4154_v12, %v946_v40  ;;  %v4305_v40 = vpack.c.bf16 %v1521_v39, %v1520_v38 }
 0xc17   :  { %v1123_v57 = vpop.f32.mrb[10].mxu1 }
 0xc18   :  { %3803 = vtanh.f32 %v949_v42  ;;  %v3128_v44 = vmul.f32 -1.442695, %v949_v42  ;;  %v3408_v58 = vpop.f32.mrb[11].mxu1 }
 0xc1a   :  { %3805 = vpow2.f32 %v3128_v44 }
 0xc22   :  { %v3804_v43 = vpop.eup %3803 }
 0xc23   :  { %959 = vrot.lane.b32.xlu0 %v3804_v43, %s4010_s4 }
 0xc24   :  { %v3806_v45 = vpop.eup %3805 }
 0xc25   :  { %v953_v46 = vadd.f32 1.0, %v3806_v45  ;;  %v1514_v45 = vld [vmem:[#allocation6] sm:$0xff] }
 0xc27   :  { %3807 = vrcp.f32 %v953_v46  ;;  %v1515_v46 = vld [vmem:[#allocation6 + $0x8] sm:$0xff] }
 0xc31   :  { %v3808_v47 = vpop.eup %3807 }
 0xc32   :  { %v957_v50 = vmul.f32 %v3808_v47, %v789_v31 }
 0xc95   :  { %v960_v48 = vpop.permute.xlu0 %959 }
 0xc96   :  { %v962_v49 = vmul.f32 %v3808_v47, %v960_v48  ;;  %v1516_v48 = vld [vmem:[#allocation6 + $0x10] sm:$0xff] }
 0xc98   :  { %964 = vrot.lane.b32.xlu1 %v962_v49, %s4011_s10  ;;  %v1517_v49 = vld [vmem:[#allocation6 + $0x18] sm:$0xff] }
 0xd0a   :  { %v965_v51 = vpop.permute.xlu1 %964 }
 0xd0b   :  { %v967_v52 = vadd.f32 %v965_v51, %v957_v50  ;;  %v3675_v51 = vpack.c.bf16 %v1517_v49, %v1516_v48 }
 0xd0d   :  { %3809 = vtanh.f32 %v967_v52 }
 0xd17   :  { %v3810_v54 = vpop.eup %3809 }
 0xd18   :  { %970 = vrot.lane.b32.xlu0 %v3810_v54, %s4010_s4  ;;  %v1879_v54 = vld [vmem:[#allocation2 + $0x4] sm:$0x3] }
 0xd8a   :  { %v971_v55 = vpop.permute.xlu0 %970 }
 0xd8b   :  { %v973_v56 = vmul.f32 %v3808_v47, %v971_v55  ;;  %v3672_v47 = vpack.c.bf16 %v1515_v46, %v1514_v45  ;;  %v2055_v55 = vld [vmem:[#allocation2 + $0x6] sm:$0x3] }
 0xd8d   :  { %975 = vrot.lane.b32.xlu1 %v973_v56, %s4011_s10 }
 0xdff   :  { %v976_v59 = vpop.permute.xlu1 %975 }
 0xe00   :  { %979 = vst.msk [vmem:[#allocation2 + $0x8] sm:$0x3] %vm266_vm3, %v976_v59  ;;  %3402 = vmatmul.mubr.msk.f32.vlgmr.msra.gmra.mrb[10].mxu0 %vm79_vm4, %v976_v59 }
 0xe01   :  { %3421 = vmatpush3.msk.msra.mxu0 %vm157_vm1, %v4124_v7  ;;  %3422 = vmatprep.mubr.msk.f32.mxu0 %vm4009_vm0, %v4008_v1 }
 0xe02   :  { %3659 = vmatprep.subr.bf16.mxu0 %v4007_v0 }
 0xe04   :  { %3423 = vmatmul.mubr.msk.f32.vlgmr.msra.gmra.mrb[12].mxu0 %vm153_vm2, %v3134_v16 }
 0xe05   :  { %3661 = vmatpush3.bf16.msra.mxu0 %v4119_v5  ;;  %3433 = vmatprep.mubr.msk.f32.mxu0 %vm4009_vm0, %v4008_v1 }
 0xe06   :  { %3662 = vmatprep.subr.bf16.mxu0 %v4007_v0 }
 0xe07   :  { %v2231_v56 = vld [vmem:[#allocation2 + $0x8] sm:$0x3] }
 0xe09   :  { %3664 = vmatpush3.bf16.msra.mxu0 %v4132_v9 }
 0xe0a   :  { %3671 = vmatprep.subr.bf16.mxu0 %v4007_v0 }
 0xed3   :  { %v1050_v60 = vpop.f32.mrb[10].mxu0 }
 0xed4   :  { %v1124_v61 = vadd.f32 %v1123_v57, %v1050_v60  ;;  %v3403_v62 = vpop.f32.mrb[11].mxu0 }
 0xed6   :  { %v1127_v63 = vadd.f32 %v4154_v12, %v1124_v61 }
 0xed7   :  { %v1301_v20 = vpop.f32.mrb[12].mxu0 }
 0xed8   :  { %3811 = vtanh.f32 %v1127_v63  ;;  %v3133_v3 = vmul.f32 -1.442695, %v1127_v63  ;;  %v3424_v21 = vpop.f32.mrb[13].mxu0 }
 0xeda   :  { %3813 = vpow2.f32 %v3133_v3 }
 0xee2   :  { %v3812_v2 = vpop.eup %3811 }
 0xee3   :  { %1137 = vrot.lane.b32.xlu0 %v3812_v2, %s4010_s4  ;;  %v4365_v2 = vld [vmem:[%s4506_s6] ss:$0 sm:$0xff] }
 0xee4   :  { %v3814_v4 = vpop.eup %3813 }
 0xee5   :  { %v1131_v6 = vadd.f32 1.0, %v3814_v4 }
 0xee7   :  { %3815 = vrcp.f32 %v1131_v6 }
 0xef1   :  { %v3816_v8 = vpop.eup %3815 }
 0xef2   :  { %v1135_v13 = vmul.f32 %v3816_v8, %v967_v52  ;;  %v1523_v52 = vld [vmem:[#allocation2] sm:$0x3] }
 0xf55   :  { %v1138_v10 = vpop.permute.xlu0 %1137 }
 0xf56   :  { %v1140_v11 = vmul.f32 %v3816_v8, %v1138_v10 }
 0xf58   :  { %1142 = vrot.lane.b32.xlu1 %v1140_v11, %s4011_s10 }
 0xfca   :  { %v1143_v14 = vpop.permute.xlu1 %1142 }
 0xfcb   :  { %v1145_v15 = vadd.f32 %v1143_v14, %v1135_v13 }
 0xfcd   :  { %3817 = vtanh.f32 %v1145_v15 }
 0xfd7   :  { %v3818_v17 = vpop.eup %3817 }
 0xfd8   :  { %1148 = vrot.lane.b32.xlu0 %v3818_v17, %s4010_s4 }
0x104a   :  { %v1149_v18 = vpop.permute.xlu0 %1148 }
0x104b   :  { %v1151_v19 = vmul.f32 %v3816_v8, %v1149_v18 }
0x104d   :  { %1153 = vrot.lane.b32.xlu1 %v1151_v19, %s4011_s10 }
0x10bf   :  { %v1154_v22 = vpop.permute.xlu1 %1153 }
0x10c0   :  { %1157 = vst.msk [vmem:[#allocation2 + $0xa] sm:$0x3] %vm266_vm3, %v1154_v22  ;;  %3418 = vmatmul.mubr.msk.f32.vlgmr.msra.gmra.mrb[12].mxu1 %vm79_vm4, %v1154_v22 }
0x10c1   :  { %3437 = vmatpush3.msk.msra.mxu1 %vm157_vm1, %v4124_v7  ;;  %3438 = vmatprep.mubr.msk.f32.mxu1 %vm4009_vm0, %v4008_v1 }
0x10c2   :  { %3665 = vmatprep.subr.bf16.mxu1 %v4007_v0 }
0x10c7   :  { %v2407_v57 = vld [vmem:[#allocation2 + $0xa] sm:$0x3] }
0x1193   :  { %v1228_v5 = vpop.f32.mrb[12].mxu1 }
0x1194   :  { %v1302_v9 = vadd.f32 %v1301_v20, %v1228_v5  ;;  %v3419_v23 = vpop.f32.mrb[13].mxu1 }
0x1196   :  { %v1305_v24 = vadd.f32 %v4154_v12, %v1302_v9  ;;  %v3139_v12 = vld [vmem:[%s4500_s0 + $0xe] sm:$0x3] }
0x1197   :  { %3439 = vmatmul.mubr.msk.f32.vlgmr.msra.gmra.mrb[14].mxu1 %vm153_vm2, %v3139_v12 }
0x1198   :  { %3819 = vtanh.f32 %v1305_v24  ;;  %v3138_v26 = vmul.f32 -1.442695, %v1305_v24  ;;  %3449 = vmatprep.mubr.msk.f32.mxu1 %vm4009_vm0, %v4008_v1  ;;  %3667 = vmatpush3.bf16.msra.mxu1 %v4298_v36 }
0x1199   :  { %3668 = vmatprep.subr.bf16.mxu1 %v4007_v0 }
0x119a   :  { %3821 = vpow2.f32 %v3138_v26 }
0x119c   :  { %3670 = vmatpush3.bf16.msra.mxu1 %v4305_v40 }
0x119d   :  { %3677 = vmatprep.subr.bf16.mxu1 %v4007_v0 }
0x119f   :  { %3450 = vmatmul.mubr.f32.vlgmr.msra.gmra.mrb[16].mxu1 %v4008_v1 }
0x11a0   :  { %3679 = vmatpush3.bf16.msra.mxu1 %v4298_v36  ;;  %3471 = vmatprep.mubr.msk.f32.mxu1 %vm4009_vm0, %v4008_v1 }
0x11a1   :  { %3680 = vmatprep.subr.bf16.mxu1 %v4007_v0 }
0x11a2   :  { %v3820_v25 = vpop.eup %3819 }
0x11a3   :  { %1315 = vrot.lane.b32.xlu0 %v3820_v25, %s4010_s4 }
0x11a4   :  { %v3822_v27 = vpop.eup %3821  ;;  %3682 = vmatpush3.bf16.msra.mxu1 %v4305_v40 }
0x11a5   :  { %v1309_v28 = vadd.f32 1.0, %v3822_v27  ;;  %3689 = vmatprep.subr.bf16.mxu1 %v4007_v0 }
0x11a7   :  { %3823 = vrcp.f32 %v1309_v28 }
0x11b1   :  { %v3824_v7 = vpop.eup %3823 }
0x11b2   :  { %v1313_v31 = vmul.f32 %v3824_v7, %v1145_v15 }
0x1215   :  { %v1316_v29 = vpop.permute.xlu0 %1315 }
0x1216   :  { %v1318_v30 = vmul.f32 %v3824_v7, %v1316_v29 }
0x1218   :  { %1320 = vrot.lane.b32.xlu1 %v1318_v30, %s4011_s10 }
0x126a   :  { %v4317_v43 = vpop.f32.mrb[14].mxu1 }
0x126b   :  { %v3440_v44 = vpop.f32.mrb[15].mxu1 }
0x1272   :  { %v1590_v59 = vpop.f32.mrb[16].mxu1 }
0x1273   :  { %v3451_v60 = vpop.f32.mrb[17].mxu1 }
0x128a   :  { %v1321_v32 = vpop.permute.xlu1 %1320 }
0x128b   :  { %v4291_v33 = vadd.f32 %v1321_v32, %v1313_v31 }
0x128d   :  { %3825 = vtanh.f32 %v4291_v33 }
0x1297   :  { %v3826_v37 = vpop.eup %3825 }
0x1298   :  { %1326 = vrot.lane.b32.xlu0 %v3826_v37, %s4010_s4 }
0x130a   :  { %v1327_v41 = vpop.permute.xlu0 %1326 }
0x130b   :  { %v1329_v42 = vmul.f32 %v3824_v7, %v1327_v41 }
0x130d   :  { %1331 = vrot.lane.b32.xlu1 %v1329_v42, %s4011_s10 }
0x137f   :  { %v1332_v50 = vpop.permute.xlu1 %1331 }
0x1380   :  { %1335 = vst.msk [vmem:[#allocation2 + $0xc] sm:$0x3] %vm266_vm3, %v1332_v50  ;;  %3434 = vmatmul.mubr.msk.f32.vlgmr.msra.gmra.mrb[14].mxu0 %vm79_vm4, %v1332_v50 }
0x1381   :  { %3673 = vmatpush3.bf16.msra.mxu0 %v3672_v47  ;;  %3460 = vmatprep.mubr.msk.f32.mxu0 %vm4009_vm0, %v4008_v1 }
0x1382   :  { %3674 = vmatprep.subr.bf16.mxu0 %v4007_v0 }
0x1385   :  { %3676 = vmatpush3.bf16.msra.mxu0 %v3675_v51 }
0x1386   :  { %3683 = vmatprep.subr.bf16.mxu0 %v4007_v0 }
0x1387   :  { %v2583_v58 = vld [vmem:[#allocation2 + $0xc] sm:$0x3] }
0x1388   :  { %3461 = vmatmul.mubr.msk.f32.vlgmr.msra.gmra.mrb[16].mxu0 %vm79_vm4, %v1523_v52 }
0x1389   :  { %3685 = vmatpush3.bf16.msra.mxu0 %v3672_v47  ;;  %3482 = vmatprep.mubr.msk.f32.mxu0 %vm4009_vm0, %v4008_v1 }
0x138a   :  { %3686 = vmatprep.subr.bf16.mxu0 %v4007_v0 }
0x138d   :  { %3688 = vmatpush3.bf16.msra.mxu0 %v3675_v51 }
0x138e   :  { %3695 = vmatprep.subr.bf16.mxu0 %v4007_v0 }
0x1390   :  { %3483 = vmatmul.mubr.msk.f32.vlgmr.msra.gmra.mrb[18].mxu0 %vm79_vm4, %v1703_v53 }
0x1391   :  { %3697 = vmatpush3.bf16.msra.mxu0 %v3672_v47  ;;  %3504 = vmatprep.mubr.msk.f32.mxu0 %vm4009_vm0, %v4008_v1 }
0x1392   :  { %3698 = vmatprep.subr.bf16.mxu0 %v4007_v0 }
0x1395   :  { %3700 = vmatpush3.bf16.msra.mxu0 %v3675_v51 }
0x1396   :  { %3707 = vmatprep.subr.bf16.mxu0 %v4007_v0 }
0x1398   :  { %3505 = vmatmul.mubr.msk.f32.vlgmr.msra.gmra.mrb[20].mxu0 %vm79_vm4, %v1879_v54 }
0x1399   :  { %3709 = vmatpush3.bf16.msra.mxu0 %v3672_v47  ;;  %3526 = vmatprep.mubr.msk.f32.mxu0 %vm4009_vm0, %v4008_v1 }
0x139a   :  { %3710 = vmatprep.subr.bf16.mxu0 %v4007_v0 }
0x139d   :  { %3712 = vmatpush3.bf16.msra.mxu0 %v3675_v51 }
0x139e   :  { %3719 = vmatprep.subr.bf16.mxu0 %v4007_v0 }
0x13a0   :  { %3527 = vmatmul.mubr.msk.f32.vlgmr.msra.gmra.mrb[22].mxu0 %vm79_vm4, %v2055_v55 }
0x13a1   :  { %3721 = vmatpush3.bf16.msra.mxu0 %v3672_v47  ;;  %3548 = vmatprep.mubr.msk.f32.mxu0 %vm4009_vm0, %v4008_v1 }
0x13a2   :  { %3722 = vmatprep.subr.bf16.mxu0 %v4007_v0 }
0x13a5   :  { %3724 = vmatpush3.bf16.msra.mxu0 %v3675_v51 }
0x13a6   :  { %3731 = vmatprep.subr.bf16.mxu0 %v4007_v0 }
0x13a8   :  { %3549 = vmatmul.mubr.msk.f32.vlgmr.msra.gmra.mrb[24].mxu0 %vm79_vm4, %v2231_v56 }
0x13a9   :  { %3733 = vmatpush3.bf16.msra.mxu0 %v3672_v47  ;;  %3570 = vmatprep.mubr.msk.f32.mxu0 %vm4009_vm0, %v4008_v1 }
0x13aa   :  { %3734 = vmatprep.subr.bf16.mxu0 %v4007_v0 }
0x13ad   :  { %3736 = vmatpush3.bf16.msra.mxu0 %v3675_v51 }
0x13ae   :  { %3743 = vmatprep.subr.bf16.mxu0 %v4007_v0 }
0x13b0   :  { %3571 = vmatmul.mubr.msk.f32.vlgmr.msra.gmra.mrb[26].mxu0 %vm79_vm4, %v2407_v57 }
0x13b1   :  { %3745 = vmatpush3.bf16.msra.mxu0 %v3672_v47  ;;  %3592 = vmatprep.mubr.msk.f32.mxu0 %vm4009_vm0, %v4008_v1 }
0x13b2   :  { %3746 = vmatprep.subr.bf16.mxu0 %v4007_v0 }
0x13b5   :  { %3748 = vmatpush3.bf16.msra.mxu0 %v3675_v51 }
0x13b6   :  { %3755 = vmatprep.subr.bf16.mxu0 %v4007_v0 }
0x13b8   :  { %3593 = vmatmul.mubr.msk.f32.vlgmr.msra.gmra.mrb[28].mxu0 %vm79_vm4, %v2583_v58 }
0x13b9   :  { %3757 = vmatpush3.bf16.msra.mxu0 %v3672_v47  ;;  %3614 = vmatprep.mubr.msk.f32.mxu0 %vm4009_vm0, %v4008_v1 }
0x13ba   :  { %3758 = vmatprep.subr.bf16.mxu0 %v4007_v0 }
0x13bd   :  { %3760 = vmatpush3.bf16.msra.mxu0 %v3675_v51 }
0x1453   :  { %v1406_v61 = vpop.f32.mrb[14].mxu0 }
0x1454   :  { %v4360_v62 = vadd.f32 %v4317_v43, %v1406_v61  ;;  %v3435_v63 = vpop.f32.mrb[15].mxu0 }
0x145b   :  { %v1663_v3 = vpop.f32.mrb[16].mxu0 }
0x145c   :  { %v1664_v4 = vadd.f32 %v1663_v3, %v1590_v59  ;;  %v3462_v6 = vpop.f32.mrb[17].mxu0 }
0x145e   :  { %v1673_v8 = vadd.f32 %v4365_v2, %v1664_v4 }
0x1460   :  { %3827 = vtanh.f32 %v1673_v8  ;;  %v3146_v9 = vmul.f32 -1.442695, %v1673_v8 }
0x1462   :  { %3829 = vpow2.f32 %v3146_v9 }
0x1463   :  { %v1845_v10 = vpop.f32.mrb[18].mxu0 }
0x1464   :  { %v3484_v11 = vpop.f32.mrb[19].mxu0 }
0x146a   :  { %v3828_v13 = vpop.eup %3827 }
0x146b   :  { %v4368_v14 = vpop.f32.mrb[20].mxu0  ;;  %1683 = vrot.lane.b32.xlu0 %v3828_v13, %s4010_s4 }
0x146c   :  { %v3506_v15 = vpop.f32.mrb[21].mxu0  ;;  %v3830_v23 = vpop.eup %3829 }
0x146d   :  { %v1677_v24 = vadd.f32 1.0, %v3830_v23 }
0x146f   :  { %3831 = vrcp.f32 %v1677_v24 }
0x1473   :  { %v4371_v16 = vpop.f32.mrb[22].mxu0 }
0x1474   :  { %v3528_v17 = vpop.f32.mrb[23].mxu0 }
0x1479   :  { %v3832_v25 = vpop.eup %3831 }
0x147a   :  { %v1681_v28 = vmul.f32 0.0, %v3832_v25 }
0x147b   :  { %v4373_v18 = vpop.f32.mrb[24].mxu0 }
0x147c   :  { %v3550_v19 = vpop.f32.mrb[25].mxu0 }
0x1483   :  { %v4375_v20 = vpop.f32.mrb[26].mxu0 }
0x1484   :  { %v3572_v21 = vpop.f32.mrb[27].mxu0 }
0x148b   :  { %v4377_v22 = vpop.f32.mrb[28].mxu0 }
0x148c   :  { %v3594_v5 = vpop.f32.mrb[29].mxu0 }
0x14dd   :  { %v1684_v26 = vpop.permute.xlu0 %1683 }
0x14de   :  { %v1686_v27 = vmul.f32 %v3832_v25, %v1684_v26 }
0x14e0   :  { %1688 = vrot.lane.b32.xlu1 %v1686_v27, %s4011_s10 }
0x1552   :  { %v1689_v7 = vpop.permute.xlu1 %1688 }
0x1553   :  { %v1691_v29 = vadd.f32 %v1689_v7, %v1681_v28 }
0x1555   :  { %3833 = vtanh.f32 %v1691_v29 }
0x155f   :  { %v3834_v30 = vpop.eup %3833 }
0x1560   :  { %1694 = vrot.lane.b32.xlu0 %v3834_v30, %s4010_s4 }
0x15d2   :  { %v1695_v31 = vpop.permute.xlu0 %1694 }
0x15d3   :  { %v1697_v32 = vmul.f32 %v3832_v25, %v1695_v31 }
0x15d5   :  { %1699 = vrot.lane.b32.xlu1 %v1697_v32, %s4011_s10 }
0x1647   :  { %v1700_v12 = vpop.permute.xlu1 %1699 }
0x1648   :  { %1702 = vst.msk [vmem:[#allocation2] sm:$0x3] %vm266_vm3, %v1700_v12  ;;  %3472 = vmatmul.mubr.msk.f32.vlgmr.msra.gmra.mrb[18].mxu1 %vm79_vm4, %v1700_v12 }
0x1649   :  { %3691 = vmatpush3.bf16.msra.mxu1 %v4298_v36  ;;  %3493 = vmatprep.mubr.msk.f32.mxu1 %vm4009_vm0, %v4008_v1 }
0x164a   :  { %3692 = vmatprep.subr.bf16.mxu1 %v4007_v0 }
0x164d   :  { %3694 = vmatpush3.bf16.msra.mxu1 %v4305_v40 }
0x164e   :  { %3701 = vmatprep.subr.bf16.mxu1 %v4007_v0 }
0x171b   :  { %v1772_v34 = vpop.f32.mrb[18].mxu1 }
0x171c   :  { %v1846_v35 = vadd.f32 %v1845_v10, %v1772_v34  ;;  %v3473_v37 = vpop.f32.mrb[19].mxu1 }
0x171e   :  { %v1849_v38 = vadd.f32 %v4365_v2, %v1846_v35 }
0x1720   :  { %3835 = vtanh.f32 %v1849_v38  ;;  %v3149_v41 = vmul.f32 -1.442695, %v1849_v38 }
0x1722   :  { %3837 = vpow2.f32 %v3149_v41 }
0x172a   :  { %v3836_v39 = vpop.eup %3835 }
0x172b   :  { %1859 = vrot.lane.b32.xlu0 %v3836_v39, %s4010_s4 }
0x172c   :  { %v3838_v42 = vpop.eup %3837 }
0x172d   :  { %v1853_v43 = vadd.f32 1.0, %v3838_v42 }
0x172f   :  { %3839 = vrcp.f32 %v1853_v43 }
0x1739   :  { %v3840_v44 = vpop.eup %3839 }
0x173a   :  { %v1857_v47 = vmul.f32 %v3840_v44, %v1691_v29 }
0x179d   :  { %v1860_v45 = vpop.permute.xlu0 %1859 }
0x179e   :  { %v1862_v46 = vmul.f32 %v3840_v44, %v1860_v45 }
0x17a0   :  { %1864 = vrot.lane.b32.xlu1 %v1862_v46, %s4011_s10 }
0x1812   :  { %v1865_v48 = vpop.permute.xlu1 %1864 }
0x1813   :  { %v1867_v49 = vadd.f32 %v1865_v48, %v1857_v47 }
0x1815   :  { %3841 = vtanh.f32 %v1867_v49 }
0x181f   :  { %v3842_v50 = vpop.eup %3841 }
0x1820   :  { %1870 = vrot.lane.b32.xlu0 %v3842_v50, %s4010_s4 }
0x1892   :  { %v1871_v51 = vpop.permute.xlu0 %1870 }
0x1893   :  { %v1873_v52 = vmul.f32 %v3840_v44, %v1871_v51 }
0x1895   :  { %1875 = vrot.lane.b32.xlu1 %v1873_v52, %s4011_s10 }
0x1907   :  { %v1876_v53 = vpop.permute.xlu1 %1875 }
0x1908   :  { %1878 = vst.msk [vmem:[#allocation2 + $0x2] sm:$0x3] %vm266_vm3, %v1876_v53  ;;  %3494 = vmatmul.mubr.msk.f32.vlgmr.msra.gmra.mrb[20].mxu1 %vm79_vm4, %v1876_v53 }
0x1909   :  { %3703 = vmatpush3.bf16.msra.mxu1 %v4298_v36  ;;  %3515 = vmatprep.mubr.msk.f32.mxu1 %vm4009_vm0, %v4008_v1 }
0x190a   :  { %3704 = vmatprep.subr.bf16.mxu1 %v4007_v0 }
0x190d   :  { %3706 = vmatpush3.bf16.msra.mxu1 %v4305_v40 }
0x190e   :  { %3713 = vmatprep.subr.bf16.mxu1 %v4007_v0 }
0x19db   :  { %v1948_v54 = vpop.f32.mrb[20].mxu1 }
0x19dc   :  { %v2022_v55 = vadd.f32 %v4368_v14, %v1948_v54  ;;  %v3495_v56 = vpop.f32.mrb[21].mxu1 }
0x19de   :  { %v2025_v57 = vadd.f32 %v4365_v2, %v2022_v55 }
0x19e0   :  { %3843 = vtanh.f32 %v2025_v57  ;;  %v3152_v59 = vmul.f32 -1.442695, %v2025_v57 }
0x19e2   :  { %3845 = vpow2.f32 %v3152_v59 }
0x19ea   :  { %v3844_v58 = vpop.eup %3843 }
0x19eb   :  { %2035 = vrot.lane.b32.xlu0 %v3844_v58, %s4010_s4 }
0x19ec   :  { %v3846_v60 = vpop.eup %3845 }
0x19ed   :  { %v2029_v61 = vadd.f32 1.0, %v3846_v60 }
0x19ef   :  { %3847 = vrcp.f32 %v2029_v61 }
0x19f9   :  { %v3848_v63 = vpop.eup %3847 }
0x19fa   :  { %v2033_v6 = vmul.f32 %v3848_v63, %v1867_v49 }
0x1a5d   :  { %v2036_v3 = vpop.permute.xlu0 %2035 }
0x1a5e   :  { %v2038_v4 = vmul.f32 %v3848_v63, %v2036_v3 }
0x1a60   :  { %2040 = vrot.lane.b32.xlu1 %v2038_v4, %s4011_s10 }
0x1ad2   :  { %v2041_v8 = vpop.permute.xlu1 %2040 }
0x1ad3   :  { %v2043_v10 = vadd.f32 %v2041_v8, %v2033_v6  ;;  %v3931_v8 = vld [vmem:[%s4503_s3] ss:$0 sm:$0xff] }
0x1ad5   :  { %3849 = vtanh.f32 %v2043_v10 }
0x1adf   :  { %v3850_v11 = vpop.eup %3849 }
0x1ae0   :  { %2046 = vrot.lane.b32.xlu0 %v3850_v11, %s4010_s4 }
0x1b52   :  { %v2047_v13 = vpop.permute.xlu0 %2046 }
0x1b53   :  { %v2049_v14 = vmul.f32 %v3848_v63, %v2047_v13 }
0x1b55   :  { %2051 = vrot.lane.b32.xlu1 %v2049_v14, %s4011_s10 }
0x1bc7   :  { %v2052_v15 = vpop.permute.xlu1 %2051 }
0x1bc8   :  { %2054 = vst.msk [vmem:[#allocation2 + $0x4] sm:$0x3] %vm266_vm3, %v2052_v15  ;;  %3516 = vmatmul.mubr.msk.f32.vlgmr.msra.gmra.mrb[22].mxu1 %vm79_vm4, %v2052_v15 }
0x1bc9   :  { %3715 = vmatpush3.bf16.msra.mxu1 %v4298_v36  ;;  %3537 = vmatprep.mubr.msk.f32.mxu1 %vm4009_vm0, %v4008_v1 }
0x1bca   :  { %3716 = vmatprep.subr.bf16.mxu1 %v4007_v0 }
0x1bcd   :  { %3718 = vmatpush3.bf16.msra.mxu1 %v4305_v40 }
0x1bce   :  { %3725 = vmatprep.subr.bf16.mxu1 %v4007_v0 }
0x1c9b   :  { %v2124_v17 = vpop.f32.mrb[22].mxu1 }
0x1c9c   :  { %v2198_v19 = vadd.f32 %v4371_v16, %v2124_v17  ;;  %v3517_v21 = vpop.f32.mrb[23].mxu1 }
0x1c9e   :  { %v2201_v5 = vadd.f32 %v4365_v2, %v2198_v19 }
0x1ca0   :  { %3851 = vtanh.f32 %v2201_v5  ;;  %v3155_v23 = vmul.f32 -1.442695, %v2201_v5 }
0x1ca2   :  { %3853 = vpow2.f32 %v3155_v23 }
0x1caa   :  { %v3852_v9 = vpop.eup %3851 }
0x1cab   :  { %2211 = vrot.lane.b32.xlu0 %v3852_v9, %s4010_s4 }
0x1cac   :  { %v3854_v24 = vpop.eup %3853 }
0x1cad   :  { %v2205_v25 = vadd.f32 1.0, %v3854_v24 }
0x1caf   :  { %3855 = vrcp.f32 %v2205_v25 }
0x1cb9   :  { %v3856_v26 = vpop.eup %3855 }
0x1cba   :  { %v2209_v7 = vmul.f32 %v3856_v26, %v2043_v10  ;;  %v1483_v10 = vadd.f32 %v3931_v8, %v4360_v62 }
0x1cbc   :  { %v3143_v14 = vmul.f32 -1.442695, %v1483_v10 }
0x1d1d   :  { %v2212_v27 = vpop.permute.xlu0 %2211 }
0x1d1e   :  { %v2214_v28 = vmul.f32 %v3856_v26, %v2212_v27 }
0x1d20   :  { %2216 = vrot.lane.b32.xlu1 %v2214_v28, %s4011_s10 }
0x1d92   :  { %v2217_v29 = vpop.permute.xlu1 %2216 }
0x1d93   :  { %v2219_v16 = vadd.f32 %v2217_v29, %v2209_v7 }
0x1d95   :  { %3857 = vtanh.f32 %v2219_v16 }
0x1d9f   :  { %v3858_v30 = vpop.eup %3857 }
0x1da0   :  { %2222 = vrot.lane.b32.xlu0 %v3858_v30, %s4010_s4 }
0x1e12   :  { %v2223_v31 = vpop.permute.xlu0 %2222 }
0x1e13   :  { %v2225_v32 = vmul.f32 %v3856_v26, %v2223_v31 }
0x1e15   :  { %2227 = vrot.lane.b32.xlu1 %v2225_v32, %s4011_s10 }
0x1e87   :  { %v2228_v12 = vpop.permute.xlu1 %2227 }
0x1e88   :  { %2230 = vst.msk [vmem:[#allocation2 + $0x6] sm:$0x3] %vm266_vm3, %v2228_v12  ;;  %3538 = vmatmul.mubr.msk.f32.vlgmr.msra.gmra.mrb[24].mxu1 %vm79_vm4, %v2228_v12 }
0x1e89   :  { %3727 = vmatpush3.bf16.msra.mxu1 %v4298_v36  ;;  %3559 = vmatprep.mubr.msk.f32.mxu1 %vm4009_vm0, %v4008_v1 }
0x1e8a   :  { %3728 = vmatprep.subr.bf16.mxu1 %v4007_v0 }
0x1e8d   :  { %3730 = vmatpush3.bf16.msra.mxu1 %v4305_v40 }
0x1e8e   :  { %3737 = vmatprep.subr.bf16.mxu1 %v4007_v0 }
0x1f5b   :  { %v2300_v34 = vpop.f32.mrb[24].mxu1 }
0x1f5c   :  { %v2374_v35 = vadd.f32 %v4373_v18, %v2300_v34  ;;  %v3539_v37 = vpop.f32.mrb[25].mxu1 }
0x1f5e   :  { %v2377_v38 = vadd.f32 %v4365_v2, %v2374_v35 }
0x1f60   :  { %3859 = vtanh.f32 %v2377_v38  ;;  %v3158_v41 = vmul.f32 -1.442695, %v2377_v38 }
0x1f62   :  { %3861 = vpow2.f32 %v3158_v41 }
0x1f6a   :  { %v3860_v39 = vpop.eup %3859 }
0x1f6b   :  { %2387 = vrot.lane.b32.xlu0 %v3860_v39, %s4010_s4 }
0x1f6c   :  { %v3862_v42 = vpop.eup %3861 }
0x1f6d   :  { %v2381_v43 = vadd.f32 1.0, %v3862_v42 }
0x1f6f   :  { %3863 = vrcp.f32 %v2381_v43 }
0x1f79   :  { %v3864_v44 = vpop.eup %3863 }
0x1f7a   :  { %v2385_v47 = vmul.f32 %v3864_v44, %v2219_v16 }
0x1fdd   :  { %v2388_v45 = vpop.permute.xlu0 %2387 }
0x1fde   :  { %v2390_v46 = vmul.f32 %v3864_v44, %v2388_v45 }
0x1fe0   :  { %2392 = vrot.lane.b32.xlu1 %v2390_v46, %s4011_s10 }
0x2052   :  { %v2393_v48 = vpop.permute.xlu1 %2392 }
0x2053   :  { %v2395_v18 = vadd.f32 %v2393_v48, %v2385_v47 }
0x2055   :  { %3865 = vtanh.f32 %v2395_v18 }
0x205f   :  { %v3866_v49 = vpop.eup %3865 }
0x2060   :  { %2398 = vrot.lane.b32.xlu0 %v3866_v49, %s4010_s4 }
0x20d2   :  { %v2399_v50 = vpop.permute.xlu0 %2398 }
0x20d3   :  { %v2401_v51 = vmul.f32 %v3864_v44, %v2399_v50 }
0x20d5   :  { %2403 = vrot.lane.b32.xlu1 %v2401_v51, %s4011_s10 }
0x2147   :  { %v2404_v52 = vpop.permute.xlu1 %2403 }
0x2148   :  { %2406 = vst.msk [vmem:[#allocation2 + $0x8] sm:$0x3] %vm266_vm3, %v2404_v52  ;;  %3560 = vmatmul.mubr.msk.f32.vlgmr.msra.gmra.mrb[26].mxu1 %vm79_vm4, %v2404_v52 }
0x2149   :  { %3739 = vmatpush3.bf16.msra.mxu1 %v4298_v36  ;;  %3581 = vmatprep.mubr.msk.f32.mxu1 %vm4009_vm0, %v4008_v1 }
0x214a   :  { %3740 = vmatprep.subr.bf16.mxu1 %v4007_v0 }
0x214d   :  { %3742 = vmatpush3.bf16.msra.mxu1 %v4305_v40 }
0x214e   :  { %3749 = vmatprep.subr.bf16.mxu1 %v4007_v0 }
0x221b   :  { %v2476_v53 = vpop.f32.mrb[26].mxu1 }
0x221c   :  { %v2550_v54 = vadd.f32 %v4375_v20, %v2476_v53  ;;  %v3561_v55 = vpop.f32.mrb[27].mxu1 }
0x221e   :  { %v2553_v56 = vadd.f32 %v4365_v2, %v2550_v54 }
0x2220   :  { %3867 = vtanh.f32 %v2553_v56  ;;  %v3161_v58 = vmul.f32 -1.442695, %v2553_v56 }
0x2222   :  { %3869 = vpow2.f32 %v3161_v58 }
0x222a   :  { %v3868_v57 = vpop.eup %3867 }
0x222b   :  { %2563 = vrot.lane.b32.xlu0 %v3868_v57, %s4010_s4 }
0x222c   :  { %v3870_v59 = vpop.eup %3869 }
0x222d   :  { %v2557_v60 = vadd.f32 1.0, %v3870_v59 }
0x222f   :  { %3871 = vrcp.f32 %v2557_v60  ;;  %v2936_v60 = vld [vmem:[#allocation2] sm:$0x3] }
0x2239   :  { %v3872_v61 = vpop.eup %3871 }
0x223a   :  { %v2561_v4 = vmul.f32 %v3872_v61, %v2395_v18 }
0x229d   :  { %v2564_v63 = vpop.permute.xlu0 %2563 }
0x229e   :  { %v2566_v3 = vmul.f32 %v3872_v61, %v2564_v63  ;;  %v2938_v63 = vld [vmem:[#allocation2 + $0x4] sm:$0x3] }
0x22a0   :  { %2568 = vrot.lane.b32.xlu1 %v2566_v3, %s4011_s10 }
0x2312   :  { %v2569_v6 = vpop.permute.xlu1 %2568 }
0x2313   :  { %v2571_v20 = vadd.f32 %v2569_v6, %v2561_v4  ;;  %v2939_v6 = vld [vmem:[#allocation2 + $0x6] sm:$0x3] }
0x2315   :  { %3873 = vtanh.f32 %v2571_v20 }
0x2316   :  { %3875 = vtanh.f32 %v1483_v10 }
0x2317   :  { %3877 = vpow2.f32 %v3143_v14 }
0x231f   :  { %v3874_v11 = vpop.eup %3873 }
0x2320   :  { %2574 = vrot.lane.b32.xlu0 %v3874_v11, %s4010_s4  ;;  %v3876_v13 = vpop.eup %3875 }
0x2321   :  { %v3878_v15 = vpop.eup %3877 }
0x2322   :  { %v1487_v17 = vadd.f32 1.0, %v3878_v15 }
0x2324   :  { %1493 = vrot.lane.b32.xlu0 %v3876_v13, %s4010_s4  ;;  %3879 = vrcp.f32 %v1487_v17 }
0x232e   :  { %v3880_v5 = vpop.eup %3879 }
0x232f   :  { %v1491_v24 = vmul.f32 %v3880_v5, %v4291_v33 }
0x2392   :  { %v2575_v19 = vpop.permute.xlu0 %2574 }
0x2393   :  { %v2577_v21 = vmul.f32 %v3872_v61, %v2575_v19  ;;  %v2937_v19 = vld [vmem:[#allocation2 + $0x2] sm:$0x3] }
0x2395   :  { %2579 = vrot.lane.b32.xlu1 %v2577_v21, %s4011_s10 }
0x2396   :  { %v1494_v9 = vpop.permute.xlu0 %1493 }
0x2397   :  { %v1496_v62 = vmul.f32 %v3880_v5, %v1494_v9 }
0x2399   :  { %1498 = vrot.lane.b32.xlu0 %v1496_v62, %s4011_s10 }
0x2407   :  { %v2580_v23 = vpop.permute.xlu1 %2579 }
0x2408   :  { %2582 = vst.msk [vmem:[#allocation2 + $0xa] sm:$0x3] %vm266_vm3, %v2580_v23  ;;  %3582 = vmatmul.mubr.msk.f32.vlgmr.msra.gmra.mrb[28].mxu1 %vm79_vm4, %v2580_v23 }
0x2409   :  { %3751 = vmatpush3.bf16.msra.mxu1 %v4298_v36  ;;  %3603 = vmatprep.mubr.msk.f32.mxu1 %vm4009_vm0, %v4008_v1 }
0x240a   :  { %3752 = vmatprep.subr.bf16.mxu1 %v4007_v0 }
0x240b   :  { %v1499_v25 = vpop.permute.xlu0 %1498 }
0x240c   :  { %v1501_v26 = vadd.f32 %v1499_v25, %v1491_v24 }
0x240d   :  { %3754 = vmatpush3.bf16.msra.mxu1 %v4305_v40 }
0x240e   :  { %3881 = vtanh.f32 %v1501_v26 }
0x240f   :  { %v2941_v10 = vld [vmem:[#allocation2 + $0xa] sm:$0x3] }
0x2418   :  { %v3882_v27 = vpop.eup %3881 }
0x2419   :  { %1504 = vrot.lane.b32.xlu0 %v3882_v27, %s4010_s4 }
0x248b   :  { %v1505_v28 = vpop.permute.xlu0 %1504 }
0x248c   :  { %v1507_v7 = vmul.f32 %v3880_v5, %v1505_v28  ;;  %v2940_v5 = vld [vmem:[#allocation2 + $0x8] sm:$0x3] }
0x248e   :  { %1509 = vrot.lane.b32.xlu0 %v1507_v7, %s4011_s10 }
0x24db   :  { %v2652_v36 = vpop.f32.mrb[28].mxu1 }
0x24dc   :  { %v2726_v29 = vadd.f32 %v4377_v22, %v2652_v36  ;;  %v3583_v1 = vpop.f32.mrb[29].mxu1 }
0x24de   :  { %v2729_v33 = vadd.f32 %v4365_v2, %v2726_v29 }
0x24e0   :  { %3883 = vtanh.f32 %v2729_v33  ;;  %v3164_v30 = vmul.f32 -1.442695, %v2729_v33  ;;  %v2983_v33 = vstv %s4508_s8 }
0x24e2   :  { %3885 = vpow2.f32 %v3164_v30 }
0x24ea   :  { %v3884_v0 = vpop.eup %3883 }
0x24eb   :  { %2739 = vrot.lane.b32.xlu1 %v3884_v0, %s4010_s4 }
0x24ec   :  { %v3886_v31 = vpop.eup %3885 }
0x24ed   :  { %v2733_v32 = vadd.f32 1.0, %v3886_v31 }
0x24ef   :  { %3887 = vrcp.f32 %v2733_v32 }
0x24f9   :  { %v3888_v12 = vpop.eup %3887 }
0x24fa   :  { %v2737_v35 = vmul.f32 %v3888_v12, %v2571_v20 }
0x2500   :  { %v1510_v16 = vpop.permute.xlu0 %1509 }
0x2501   :  { %1513 = vst.msk [vmem:[#allocation2 + $0xe] sm:$0x3] %vm266_vm3, %v1510_v16 }
0x2508   :  { %v2759_v40 = vld [vmem:[#allocation2 + $0xe] sm:$0x3] }
0x2509   :  { %3615 = vmatmul.mubr.msk.f32.vlgmr.msra.gmra.mrb[30].mxu0 %vm79_vm4, %v2759_v40 }
0x255d   :  { %v2740_v22 = vpop.permute.xlu1 %2739 }
0x255e   :  { %v2742_v34 = vmul.f32 %v3888_v12, %v2740_v22 }
0x2560   :  { %2744 = vrot.lane.b32.xlu1 %v2742_v34, %s4011_s10 }
0x25d2   :  { %v2745_v37 = vpop.permute.xlu1 %2744 }
0x25d3   :  { %v2747_v38 = vadd.f32 %v2745_v37, %v2737_v35 }
0x25d5   :  { %3889 = vtanh.f32 %v2747_v38 }
0x25dc   :  { %v2901_v39 = vpop.f32.mrb[30].mxu0 }
0x25dd   :  { %v3616_v41 = vpop.f32.mrb[31].mxu0 }
0x25df   :  { %v3890_v42 = vpop.eup %3889 }
0x25e0   :  { %2750 = vrot.lane.b32.xlu1 %v3890_v42, %s4010_s4 }
0x2652   :  { %v2751_v43 = vpop.permute.xlu1 %2750 }
0x2653   :  { %v2753_v44 = vmul.f32 %v3888_v12, %v2751_v43 }
0x2655   :  { %2755 = vrot.lane.b32.xlu1 %v2753_v44, %s4011_s10 }
0x26c7   :  { %v2756_v45 = vpop.permute.xlu1 %2755 }
0x26c8   :  { %2758 = vst.msk [vmem:[#allocation2 + $0xc] sm:$0x3] %vm266_vm3, %v2756_v45  ;;  %3604 = vmatmul.mubr.msk.f32.vlgmr.msra.gmra.mrb[30].mxu1 %vm79_vm4, %v2756_v45 }
0x26cf   :  { %v2942_v23 = vld [vmem:[#allocation2 + $0xc] sm:$0x3] }
0x279b   :  { %v2828_v46 = vpop.f32.mrb[30].mxu1 }
0x279c   :  { %v2902_v47 = vadd.f32 %v2901_v39, %v2828_v46  ;;  %v3605_v48 = vpop.f32.mrb[31].mxu1 }
0x279e   :  { %v2905_v18 = vadd.f32 %v4365_v2, %v2902_v47  ;;  %v3168_v2 = vld [vmem:[%s4507_s7] ss:$0 sm:$0xff] }
0x279f   :  { %v2950_v61 = vmul.f32 %v3168_v2, %v2936_v60  ;;  %v2952_v4 = vmul.f32 %v3168_v2, %v2938_v63  ;;  %v2953_v8 = vmul.f32 %v3168_v2, %v2939_v6  ;;  %v2955_v13 = vmul.f32 %v3168_v2, %v2941_v10 }
0x27a0   :  { %3891 = vtanh.f32 %v2905_v18  ;;  %v3167_v50 = vmul.f32 -1.442695, %v2905_v18  ;;  %v2951_v21 = vmul.f32 %v3168_v2, %v2937_v19  ;;  %v2954_v62 = vmul.f32 %v3168_v2, %v2940_v5 }
0x27a1   :  { %v2958_v3 = vsel %vm266_vm3, %v2950_v61, 0.0  ;;  %v2964_v20 = vsel %vm266_vm3, %v2952_v4, 0.0  ;;  %v2967_v11 = vsel %vm266_vm3, %v2953_v8, 0.0  ;;  %v2973_v14 = vsel %vm266_vm3, %v2955_v13, 0.0 }
0x27a2   :  { %3893 = vpow2.f32 %v3167_v50  ;;  %v2961_v9 = vsel %vm266_vm3, %v2951_v21, 0.0  ;;  %v2970_v24 = vsel %vm266_vm3, %v2954_v62, 0.0  ;;  %v2956_v25 = vmul.f32 %v3168_v2, %v2942_v23 }
0x27a4   :  { %v2976_v26 = vsel %vm266_vm3, %v2956_v25, 0.0 }
0x27aa   :  { %v3892_v49 = vpop.eup %3891 }
0x27ab   :  { %2915 = vrot.lane.b32.xlu0 %v3892_v49, %s4010_s4 }
0x27ac   :  { %v3894_v51 = vpop.eup %3893 }
0x27ad   :  { %v2909_v52 = vadd.f32 1.0, %v3894_v51 }
0x27af   :  { %3895 = vrcp.f32 %v2909_v52 }
0x27b9   :  { %v3896_v53 = vpop.eup %3895 }
0x27ba   :  { %v2913_v56 = vmul.f32 %v3896_v53, %v2747_v38 }
0x281d   :  { %v2916_v54 = vpop.permute.xlu0 %2915 }
0x281e   :  { %v2918_v55 = vmul.f32 %v3896_v53, %v2916_v54 }
0x2820   :  { %2920 = vrot.lane.b32.xlu1 %v2918_v55, %s4011_s10 }
0x2892   :  { %v2921_v57 = vpop.permute.xlu1 %2920 }
0x2893   :  { %v2923_v58 = vadd.f32 %v2921_v57, %v2913_v56  ;;  %v3048_v56 = vlaneseq }
0x2895   :  { %3897 = vtanh.f32 %v2923_v58  ;;  %v3049_v61 = vand.u32 127, %v3048_v56  ;;  %v3051_v63 = vshrl.u32 %v3048_v56, 7 }
0x289f   :  { %v3898_v59 = vpop.eup %3897 }
0x28a0   :  { %2926 = vrot.lane.b32.xlu0 %v3898_v59, %s4010_s4 }
0x28bf   :  { %2959 = vadd.xlane.f32.xlu0 %v2958_v3 }
0x28c3   :  { %2965 = vadd.xlane.f32.xlu0 %v2964_v20  ;;  %v3052_v20 = vsub.s32 %v3049_v61, %v3051_v63 }
0x28c7   :  { %2968 = vadd.xlane.f32.xlu0 %v2967_v11 }
0x28cb   :  { %2974 = vadd.xlane.f32.xlu0 %v2973_v14 }
0x2912   :  { %v2927_v15 = vpop.permute.xlu0 %2926 }
0x2913   :  { %v2929_v17 = vmul.f32 %v3896_v53, %v2927_v15 }
0x2915   :  { %2931 = vrot.lane.b32.xlu1 %v2929_v17, %s4011_s10 }
0x2939   :  { %2962 = vadd.xlane.f32.xlu1 %v2961_v9 }
0x293d   :  { %2971 = vadd.xlane.f32.xlu1 %v2970_v24 }
0x2941   :  { %2977 = vadd.xlane.f32.xlu1 %v2976_v26 }
0x294c   :  { %v2960_v29 = vpop.xlane.xlu0 %2959 }
0x294d   :  { %v2984_v40 = vadd.f32 %v2983_v33, %v2960_v29 }
0x294f   :  { %v3169_v22 = vmul.f32 -1.442695, %v2984_v40 }
0x2950   :  { %v2966_v0 = vpop.xlane.xlu0 %2965 }
0x2951   :  { %v2986_v30 = vadd.f32 %v2983_v33, %v2966_v0 }
0x2953   :  { %v3171_v34 = vmul.f32 -1.442695, %v2986_v30 }
0x2954   :  { %v2969_v12 = vpop.xlane.xlu0 %2968 }
0x2955   :  { %v2987_v35 = vadd.f32 %v2983_v33, %v2969_v12 }
0x2957   :  { %v3172_v41 = vmul.f32 -1.442695, %v2987_v35 }
0x2958   :  { %v2975_v39 = vpop.xlane.xlu0 %2974 }
0x2959   :  { %v2989_v44 = vadd.f32 %v2983_v33, %v2975_v39 }
0x295b   :  { %v3174_v47 = vmul.f32 -1.442695, %v2989_v44 }
0x2987   :  { %v2932_v27 = vpop.permute.xlu1 %2931 }
0x2988   :  { %2934 = vst.msk [vmem:[#allocation2 + $0xe] sm:$0x3] %vm266_vm3, %v2932_v27 }
0x298f   :  { %v2943_v28 = vld [vmem:[#allocation2 + $0xe] sm:$0x3] }
0x2990   :  { %v2957_v7 = vmul.f32 %v3168_v2, %v2943_v28 }
0x2992   :  { %v2979_v36 = vsel %vm266_vm3, %v2957_v7, 0.0 }
0x2993   :  { %2980 = vadd.xlane.f32.xlu0 %v2979_v36 }
0x29c6   :  { %v2963_v1 = vpop.xlane.xlu1 %2962 }
0x29c7   :  { %v2985_v16 = vadd.f32 %v2983_v33, %v2963_v1 }
0x29c9   :  { %v3170_v31 = vmul.f32 -1.442695, %v2985_v16 }
0x29ca   :  { %v2972_v32 = vpop.xlane.xlu1 %2971 }
0x29cb   :  { %3899 = vpow2.f32 %v3170_v31  ;;  %v2988_v37 = vadd.f32 %v2983_v33, %v2972_v32 }
0x29cc   :  { %3901 = vpow2.f32 %v3169_v22 }
0x29cd   :  { %3903 = vpow2.f32 %v3171_v34  ;;  %v3173_v42 = vmul.f32 -1.442695, %v2988_v37 }
0x29ce   :  { %v2978_v38 = vpop.xlane.xlu1 %2977  ;;  %3905 = vpow2.f32 %v3172_v41 }
0x29cf   :  { %v2990_v43 = vadd.f32 %v2983_v33, %v2978_v38  ;;  %3907 = vpow2.f32 %v3173_v42 }
0x29d1   :  { %v3175_v45 = vmul.f32 -1.442695, %v2990_v43 }
0x29d3   :  { %3909 = vpow2.f32 %v3175_v45 }
0x29d4   :  { %3911 = vpow2.f32 %v3174_v47 }
0x29d5   :  { %v3900_v46 = vpop.eup %3899 }
0x29d6   :  { %v3902_v48 = vpop.eup %3901  ;;  %v3017_v18 = vadd.f32 1.0, %v3900_v46 }
0x29d7   :  { %v3904_v49 = vpop.eup %3903  ;;  %v3016_v50 = vadd.f32 1.0, %v3902_v48 }
0x29d8   :  { %v3018_v51 = vadd.f32 1.0, %v3904_v49  ;;  %3913 = vrcp.f32 %v3017_v18  ;;  %v3906_v53 = vpop.eup %3905 }
0x29d9   :  { %v3908_v55 = vpop.eup %3907  ;;  %3915 = vrcp.f32 %v3016_v50  ;;  %v3019_v58 = vadd.f32 1.0, %v3906_v53 }
0x29da   :  { %3917 = vrcp.f32 %v3018_v51  ;;  %v3020_v59 = vadd.f32 1.0, %v3908_v55 }
0x29dd   :  { %v3910_v2 = vpop.eup %3909 }
0x29de   :  { %v3912_v60 = vpop.eup %3911  ;;  %v3022_v3 = vadd.f32 1.0, %v3910_v2 }
0x29df   :  { %v3021_v6 = vadd.f32 1.0, %v3912_v60 }
0x29e2   :  { %v3914_v4 = vpop.eup %3913 }
0x29e3   :  { %v3916_v8 = vpop.eup %3915  ;;  %v3057_v10 = vrot.slane %v3914_v4, %v3052_v20 }
0x29e4   :  { %v3918_v11 = vpop.eup %3917  ;;  %v3053_v14 = vrot.slane %v3916_v8, %v3052_v20 }
0x29e5   :  { %v3061_v21 = vrot.slane %v3918_v11, %v3052_v20 }
0x29e6   :  { %v3083_v17 = vsel %vm3082_vm5, %v3057_v10, %v3053_v14 }
0x29e7   :  { %v3085_v9 = vsel %vm3084_vm6, %v3061_v21, %v3083_v17 }
0x2a20   :  { %v2981_v52 = vpop.xlane.xlu0 %2980 }
0x2a21   :  { %v2991_v54 = vadd.f32 %v2983_v33, %v2981_v52 }
0x2a23   :  { %v3176_v57 = vmul.f32 -1.442695, %v2991_v54 }
0x2a25   :  { %3919 = vpow2.f32 %v3176_v57 }
0x2a26   :  { %3921 = vrcp.f32 %v3019_v58 }
0x2a27   :  { %3923 = vrcp.f32 %v3020_v59 }
0x2a28   :  { %3925 = vrcp.f32 %v3022_v3 }
0x2a29   :  { %3927 = vrcp.f32 %v3021_v6 }
0x2a2f   :  { %v3920_v13 = vpop.eup %3919 }
0x2a30   :  { %v3023_v15 = vadd.f32 1.0, %v3920_v13  ;;  %v3922_v19 = vpop.eup %3921 }
0x2a31   :  { %v3924_v5 = vpop.eup %3923  ;;  %v3065_v62 = vrot.slane %v3922_v19, %v3052_v20 }
0x2a32   :  { %3929 = vrcp.f32 %v3023_v15  ;;  %v3069_v23 = vrot.slane %v3924_v5, %v3052_v20  ;;  %v3926_v24 = vpop.eup %3925 }
0x2a33   :  { %v3087_v25 = vsel %vm3086_vm7, %v3065_v62, %v3085_v9  ;;  %v3928_v26 = vpop.eup %3927  ;;  %v3077_v28 = vrot.slane %v3926_v24, %v3052_v20 }
0x2a34   :  { %v3089_v27 = vsel %vm3088_vm8, %v3069_v23, %v3087_v25  ;;  %v3073_v7 = vrot.slane %v3928_v26, %v3052_v20 }
0x2a36   :  { %v3091_v29 = vsel %vm3090_vm9, %v3073_v7, %v3089_v27 }
0x2a37   :  { %v3093_v33 = vsel %vm3092_vm10, %v3077_v28, %v3091_v29 }
0x2a3c   :  { %v3930_v36 = vpop.eup %3929 }
0x2a3d   :  { %v3081_v1 = vrot.slane %v3930_v36, %v3052_v20 }
0x2a3f   :  { %v3095_v0 = vsel %vm3094_vm11, %v3081_v1, %v3093_v33 }
0x2a40   :  { %3098 = vst.msk [vmem:[%s4509_s9] sm:$0xff] %vm3097_vm12, %v3095_v0 }
0x2a41   :  { %3103 = vsyncpa [#allocation5], 1 }
0x2a42   :  { %3104 = vsyncpa [#allocation7], 1 }

</bundles_post_ra>
